<compile_context>
chip_gen: v6e
topology: v6e:2x2x1
jax: 0.10.0
libtpu: 0.0.40
codegen_flags: <defaults>
</compile_context>

<pallas_src>
import functools

import jax
import jax.numpy as jnp
from jax.experimental import pallas as pl
from jax.experimental.pallas import tpu as pltpu


NEG_INF = -9e15  # same masking constant as the PyTorch module


def _leaky_relu(x, alpha):
    return jnp.where(x > 0, x, alpha * x)


def _elu(x):
    return jnp.where(x > 0, x, jnp.exp(jnp.minimum(x, 0.0)) - 1.0)


# ----------------------------------------------------------------------------
# Fused forward kernel: one grid step == Bt batch elements, all 4 GAT layers
# plus the final avg-pool (intermediates never leave VMEM).
# ----------------------------------------------------------------------------
def gpgat_fused_kernel(x_ref,
                       wg0_ref, wg1_ref, wp0_ref, wp1_ref,
                       mg0_ref, mg1_ref, mp0_ref, mp1_ref,
                       dt0_ref, dt1_ref, ss0_ref, ss1_ref, bd0_ref,
                       onesbd_ref,
                       o_ref, *, bt, n, hidden, nheads, alpha, precise):
    mxu_dt = jnp.float32 if precise else jnp.bfloat16
    ones_bd = onesbd_ref[...]                      # (bt*n, bt*n) per-element coupling

    def gat_layer(h, w_ref, mask_ref, dt_ref, ss_ref, bd_ref, heads):
        """Multi-head dense GAT layer, all heads lane-packed into one block."""
        hf, hn = heads * hidden, heads * n
        # ONE wide projection matmul: columns = [Wh | e_src (lane-expanded) | e_dst]
        y = jnp.dot(h.astype(mxu_dt), w_ref[...],
                    preferred_element_type=jnp.float32)        # (bt*n, hf+2*hn)
        wh = y[:, :hf]                                         # (bt*n, hf)
        e_src = y[:, hf:hf + hn]                               # already packed per head
        e_dst = y[:, hf + hn:hf + 2 * hn]                      # per-row value, per head
        # pack e_dst: row b*n+i, lane h*n+j  ->  e_dst of node j of element b.
        e_dst = jnp.dot(ones_bd, e_dst * dt_ref[...],
                        preferred_element_type=jnp.float32)    # (bt*n, hn)
        # LeakyReLU + hoisted additive adjacency mask (full 128-lane elementwise).
        logits = _leaky_relu(e_src + e_dst, alpha) + mask_ref[...]
        # Shared per-row shift: softmax is shift-invariant per head segment.
        m = jnp.max(logits, axis=-1, keepdims=True)
        p = jnp.exp(logits - m)
        # Per-head denominators (already lane-expanded) via one segment-sum matmul.
        denom = jnp.dot(p, ss_ref[...], preferred_element_type=jnp.float32)
        if precise:
            att = p / denom                                    # exact (validation)
        else:
            att = p * pl.reciprocal(denom, approx=True)        # EUP slot
        # Attention apply: one block-diagonal matmul per element; output is
        # already in torch.cat(dim=-1) layout (no per-head concatenate).
        outs = []
        for b in range(bt):                                    # static unroll
            att_b = att[b * n:(b + 1) * n, :]                  # (n, hn)
            wh_b = wh[b * n:(b + 1) * n, :]                    # (n, hf)
            if heads == 1:
                rhs = wh_b
            else:
                rhs = jnp.tile(wh_b, (heads, 1)) * bd_ref[...]  # (hn, hf) block-diag
            ob = jnp.dot(att_b.astype(mxu_dt), rhs.astype(mxu_dt),
                         preferred_element_type=jnp.float32)    # (n, hf)
            # TODO(synk): drop ELU here if the real output layer uses concat=False.
            outs.append(_elu(ob))
        return outs[0] if bt == 1 else jnp.concatenate(outs, axis=0)

    h = x_ref[...]                                             # (bt*n, Fin) f32
    # global attention stack (dropout = identity in eval mode)
    h = gat_layer(h, wg0_ref, mg0_ref, dt0_ref, ss0_ref, bd0_ref, nheads[0])
    h = gat_layer(h, wg1_ref, mg1_ref, dt1_ref, ss1_ref, None, nheads[1])
    # prior attention stack
    h = gat_layer(h, wp0_ref, mp0_ref, dt0_ref, ss0_ref, bd0_ref, nheads[0])
    h = gat_layer(h, wp1_ref, mp1_ref, dt1_ref, ss1_ref, None, nheads[1])
    # pool='avg': AdaptiveAvgPool1d over the node/class dim, per batch element.
    pooled = [jnp.mean(h[b * n:(b + 1) * n, :], axis=0, keepdims=True)
              for b in range(bt)]
    o_ref[0] = pooled[0] if bt == 1 else jnp.concatenate(pooled, axis=0)


# ----------------------------------------------------------------------------
# Host-side precompute + pallas_call wrapper.
# ----------------------------------------------------------------------------
def _build_w_plus(W, a_src, a_dst, n_nodes, dtype):
    """[W | (W_h @ a_src_h) lane-expanded | (W_h @ a_dst_h) lane-expanded]."""
    fin, hf = W.shape
    heads, fout = a_src.shape
    assert hf == heads * fout
    w3 = W.reshape(fin, heads, fout)
    wa_src = jnp.einsum("fhk,hk->fh", w3, a_src)               # (fin, heads)
    wa_dst = jnp.einsum("fhk,hk->fh", w3, a_dst)
    wa_src = jnp.repeat(wa_src, n_nodes, axis=1)               # (fin, heads*n)
    wa_dst = jnp.repeat(wa_dst, n_nodes, axis=1)
    return jnp.concatenate([W, wa_src, wa_dst], axis=1).astype(dtype)


def _pick_batch_tile(batch):
    # Fold batch rows per grid step to fill MXU rows, but keep >=2 parallel
    # grid steps so both v7x TensorCores stay busy.
    for bt in (8, 4, 2):
        if batch % bt == 0 and batch // bt >= 2:
            return bt
    return 1


def gpgat_seq_forward(x, params, A_global, A_prior, *, nheads, hidden_dim,
                      alpha=0.2, precise=False, batch_tile=None):
    """Eval-mode GPGAT_seq forward.  x: (B, N, Fin) -> (B, hidden_dim)."""
    B, N, Fin = x.shape
    h0, h1 = int(nheads[0]), int(nheads[1])
    assert h1 == 1, "output GAT layer is expected to be single-head"
    bt = int(batch_tile) if batch_tile else _pick_batch_tile(B)
    assert B % bt == 0
    w_dtype = jnp.float32 if precise else jnp.bfloat16

    # (1) fold a_src/a_dst contractions into the projection weights.
    wg0 = _build_w_plus(params["g0"]["W"], params["g0"]["a_src"],
                        params["g0"]["a_dst"], N, w_dtype)
    wg1 = _build_w_plus(params["g1"]["W"], params["g1"]["a_src"],
                        params["g1"]["a_dst"], N, w_dtype)
    wp0 = _build_w_plus(params["p0"]["W"], params["p0"]["a_src"],
                        params["p0"]["a_dst"], N, w_dtype)
    wp1 = _build_w_plus(params["p1"]["W"], params["p1"]["a_src"],
                        params["p1"]["a_dst"], N, w_dtype)
    # (2) additive adjacency masks, hoisted and packed to (bt*N, heads*N).
    mask_g = jnp.where(A_global > 0, 0.0, NEG_INF).astype(jnp.float32)
    mask_p = jnp.where(A_prior > 0, 0.0, NEG_INF).astype(jnp.float32)
    mg0, mg1 = jnp.tile(mask_g, (bt, h0)), jnp.tile(mask_g, (bt, h1))
    mp0, mp1 = jnp.tile(mask_p, (bt, h0)), jnp.tile(mask_p, (bt, h1))
    # (3) structural constants for the lane-packed softmax / block-diag apply.
    eye_n = jnp.eye(N, dtype=jnp.float32)
    ones_nn = jnp.ones((N, N), jnp.float32)
    dt0, dt1 = jnp.tile(eye_n, (bt, h0)), jnp.tile(eye_n, (bt, h1))
    ss0 = jnp.kron(jnp.eye(h0, dtype=jnp.float32), ones_nn)
    ss1 = jnp.kron(jnp.eye(h1, dtype=jnp.float32), ones_nn)
    bd0 = jnp.kron(jnp.eye(h0, dtype=jnp.float32),
                   jnp.ones((N, hidden_dim), jnp.float32))
    onesbd = jnp.kron(jnp.eye(bt, dtype=jnp.float32), ones_nn)

    x2 = x.reshape(B * N, Fin).astype(jnp.float32)
    weights = [wg0, wg1, wp0, wp1]
    consts = [mg0, mg1, mp0, mp1, dt0, dt1, ss0, ss1, bd0, onesbd]

    def _const_spec(a):                      # grid-invariant full block
        return pl.BlockSpec(a.shape, lambda b: (0,) * a.ndim)

    in_specs = ([pl.BlockSpec((bt * N, Fin), lambda b: (b, 0))]
                + [_const_spec(a) for a in weights]
                + [_const_spec(a) for a in consts])

    kernel = functools.partial(
        gpgat_fused_kernel, bt=bt, n=N, hidden=hidden_dim,
        nheads=(h0, h1), alpha=alpha, precise=precise)

    out = pl.pallas_call(
        kernel,
        out_shape=jax.ShapeDtypeStruct((B // bt, bt, hidden_dim), jnp.float32),
        grid_spec=pltpu.PrefetchScalarGridSpec(
            num_scalar_prefetch=0,
            grid=(B // bt,),
            in_specs=in_specs,
            out_specs=pl.BlockSpec((1, bt, hidden_dim), lambda b: (b, 0, 0)),
        ),
        compiler_params=pltpu.CompilerParams(
            dimension_semantics=("parallel",)),   # megacore split over batch
    )(x2, *weights, *consts)

    return out.reshape(B, hidden_dim)


# ----------------------------------------------------------------------------
# Pure-JAX reference (per-head loops, torch-style where-masking) for validation.
# ----------------------------------------------------------------------------
def _gat_layer_ref(h, W, a_src, a_dst, adj, alpha):
    heads, fout = a_src.shape
    outs = []
    for k in range(heads):
        wh = h @ W[:, k * fout:(k + 1) * fout]
        e = _leaky_relu((wh @ a_src[k])[:, None] + (wh @ a_dst[k])[None, :], alpha)
        e = jnp.where(adj > 0, e, NEG_INF)
        att = jax.nn.softmax(e, axis=-1)
        outs.append(_elu(att @ wh))
    return jnp.concatenate(outs, axis=-1)


def gpgat_seq_reference(x, params, A_global, A_prior, *, alpha):
    outs = []
    for b in range(x.shape[0]):
        h = x[b]
        for name, adj in (("g0", A_global), ("g1", A_global),
                          ("p0", A_prior), ("p1", A_prior)):
            p = params[name]
            h = _gat_layer_ref(h, p["W"], p["a_src"], p["a_dst"], adj, alpha)
        outs.append(jnp.mean(h, axis=0))
    return jnp.stack(outs)


# ----------------------------------------------------------------------------
# Parameter / adjacency construction (deterministic, in-script).
# ----------------------------------------------------------------------------
def init_layer_params(key, heads, fin, fout):
    k1, k2, k3 = jax.random.split(key, 3)
    W = jax.random.normal(k1, (fin, heads * fout), jnp.float32) * 0.02
    a_src = jax.random.normal(k2, (heads, fout), jnp.float32) * 0.02
    a_dst = jax.random.normal(k3, (heads, fout), jnp.float32) * 0.02
    return {"W": W, "a_src": a_src, "a_dst": a_dst}


def gen_A_synthetic(key, num_classes, t):
    # mirrors gen_A(debug='random'): zero diag, threshold at t, + identity, .T
    # TODO(synk): real model loads co-occurrence stats from adj_file (.npz).
    eye = jnp.eye(num_classes, dtype=jnp.float32)
    raw = jax.random.uniform(key, (num_classes, num_classes), jnp.float32)
    raw = raw * (1.0 - eye)
    a_hat = jnp.where(raw < t, 0.0, 1.0) + eye
    return a_hat.T


def build_params(key, num_classes, input_dim, hidden_dim, nheads, adj_t):
    ks = jax.random.split(key, 6)
    params = {
        "g0": init_layer_params(ks[0], nheads[0], input_dim, hidden_dim),
        "g1": init_layer_params(ks[1], nheads[1], hidden_dim * nheads[0], hidden_dim),
        "p0": init_layer_params(ks[2], nheads[0], hidden_dim, hidden_dim),
        "p1": init_layer_params(ks[3], nheads[1], hidden_dim * nheads[0], hidden_dim),
    }
    A_hat_prior = gen_A_synthetic(ks[4], num_classes, adj_t)    # thresholded
    A_hat_global = gen_A_synthetic(ks[5], num_classes, -1.0)    # t=-1 -> all edges
    return params, A_hat_global, A_hat_prior


if __name__ == "__main__":
    B = 2
    num_classes = 16
    input_dim = 32
    hidden_dim = 32
    nheads = [8, 1]
    alpha = 0.2
    adj_t = 0.5

    key = jax.random.PRNGKey(0)
    k_x, k_p = jax.random.split(key)
    x = jax.random.normal(k_x, (B, num_classes, input_dim), jnp.float32)
    params, A_global, A_prior = build_params(
        k_p, num_classes, input_dim, hidden_dim, nheads, adj_t)

    # precise path (f32 MXU operands + exact division), checked vs pure-JAX ref
    out_precise = gpgat_seq_forward(x, params, A_global, A_prior,
                                    nheads=nheads, hidden_dim=hidden_dim,
                                    alpha=alpha, precise=True)
    out_precise = jax.block_until_ready(out_precise)
    ref = gpgat_seq_reference(x, params, A_global, A_prior, alpha=alpha)
    assert out_precise.shape == (B, hidden_dim), out_precise.shape
    assert bool(jnp.allclose(out_precise, ref, rtol=1e-2, atol=1e-7)), (
        "max abs err = %e" % float(jnp.max(jnp.abs(out_precise - ref))))

    # fast path (bf16 MXU operands + approx reciprocal) - the perf default
    out_fast = gpgat_seq_forward(x, params, A_global, A_prior,
                                 nheads=nheads, hidden_dim=hidden_dim,
                                 alpha=alpha, precise=False)
    out_fast = jax.block_until_ready(out_fast)
    assert out_fast.shape == (B, hidden_dim), out_fast.shape
    assert bool(jnp.all(jnp.isfinite(out_fast)))
    print("KERNEL_OK")
</pallas_src>

<mosaic_0001>
module attributes {stable_mosaic.version = 11 : i64} {
  func.func @gpgat_fused_kernel(%arg0: i32, %arg1: memref<16x32xf32, #tpu.memory_space<vmem>>, %arg2: memref<32x512xf32, #tpu.memory_space<vmem>>, %arg3: memref<256x64xf32, #tpu.memory_space<vmem>>, %arg4: memref<32x512xf32, #tpu.memory_space<vmem>>, %arg5: memref<256x64xf32, #tpu.memory_space<vmem>>, %arg6: memref<16x128xf32, #tpu.memory_space<vmem>>, %arg7: memref<16x16xf32, #tpu.memory_space<vmem>>, %arg8: memref<16x128xf32, #tpu.memory_space<vmem>>, %arg9: memref<16x16xf32, #tpu.memory_space<vmem>>, %arg10: memref<16x128xf32, #tpu.memory_space<vmem>>, %arg11: memref<16x16xf32, #tpu.memory_space<vmem>>, %arg12: memref<128x128xf32, #tpu.memory_space<vmem>>, %arg13: memref<16x16xf32, #tpu.memory_space<vmem>>, %arg14: memref<128x256xf32, #tpu.memory_space<vmem>>, %arg15: memref<16x16xf32, #tpu.memory_space<vmem>>, %arg16: memref<1x1x32xf32, #tpu.memory_space<vmem>>) attributes {dimension_semantics = [#tpu.dimension_semantics<parallel>], iteration_bounds = array<i64: 2>, scalar_prefetch = 0 : i64, scratch_operands = 0 : i64, tpu.core_type = #tpu.core_type<tc>, window_params = [{transform_indices = @transform_0, window_bounds = array<i64: 16, 32>}, {pipeline_mode = #tpu.pipeline_mode<synchronous>, transform_indices = @transform_1, window_bounds = array<i64: 32, 512>}, {pipeline_mode = #tpu.pipeline_mode<synchronous>, transform_indices = @transform_2, window_bounds = array<i64: 256, 64>}, {pipeline_mode = #tpu.pipeline_mode<synchronous>, transform_indices = @transform_3, window_bounds = array<i64: 32, 512>}, {pipeline_mode = #tpu.pipeline_mode<synchronous>, transform_indices = @transform_4, window_bounds = array<i64: 256, 64>}, {pipeline_mode = #tpu.pipeline_mode<synchronous>, transform_indices = @transform_5, window_bounds = array<i64: 16, 128>}, {pipeline_mode = #tpu.pipeline_mode<synchronous>, transform_indices = @transform_6, window_bounds = array<i64: 16, 16>}, {pipeline_mode = #tpu.pipeline_mode<synchronous>, transform_indices = @transform_7, window_bounds = array<i64: 16, 128>}, {pipeline_mode = #tpu.pipeline_mode<synchronous>, transform_indices = @transform_8, window_bounds = array<i64: 16, 16>}, {pipeline_mode = #tpu.pipeline_mode<synchronous>, transform_indices = @transform_9, window_bounds = array<i64: 16, 128>}, {pipeline_mode = #tpu.pipeline_mode<synchronous>, transform_indices = @transform_10, window_bounds = array<i64: 16, 16>}, {pipeline_mode = #tpu.pipeline_mode<synchronous>, transform_indices = @transform_11, window_bounds = array<i64: 128, 128>}, {pipeline_mode = #tpu.pipeline_mode<synchronous>, transform_indices = @transform_12, window_bounds = array<i64: 16, 16>}, {pipeline_mode = #tpu.pipeline_mode<synchronous>, transform_indices = @transform_13, window_bounds = array<i64: 128, 256>}, {pipeline_mode = #tpu.pipeline_mode<synchronous>, transform_indices = @transform_14, window_bounds = array<i64: 16, 16>}, {transform_indices = @transform_15, window_bounds = array<i64: 1, 1, 32>}]} {
    %c0 = arith.constant 0 : index
    %c0_0 = arith.constant 0 : index
    %0 = vector.load %arg15[%c0, %c0_0] : memref<16x16xf32, #tpu.memory_space<vmem>>, vector<16x16xf32>
    %c0_1 = arith.constant 0 : index
    %c0_2 = arith.constant 0 : index
    %1 = vector.load %arg1[%c0_1, %c0_2] : memref<16x32xf32, #tpu.memory_space<vmem>>, vector<16x32xf32>
    %c0_3 = arith.constant 0 : index
    %c0_4 = arith.constant 0 : index
    %2 = vector.load %arg2[%c0_3, %c0_4] : memref<32x512xf32, #tpu.memory_space<vmem>>, vector<32x512xf32>
    %cst = arith.constant dense<0.000000e+00> : vector<16x512xf32>
    %3 = tpu.matmul %1, %2, %cst {dimension_numbers = #tpu.dot_dimension_numbers<[1], [0], [0], [1], [0, 0, 1, 1], [], []>} : vector<16x32xf32>, vector<32x512xf32>, vector<16x512xf32> -> vector<16x512xf32>
    %4 = vector.extract_strided_slice %3 {offsets = [0, 0], sizes = [16, 256], strides = [1, 1]} : vector<16x512xf32> to vector<16x256xf32>
    %5 = vector.extract_strided_slice %3 {offsets = [0, 256], sizes = [16, 128], strides = [1, 1]} : vector<16x512xf32> to vector<16x128xf32>
    %6 = vector.extract_strided_slice %3 {offsets = [0, 384], sizes = [16, 128], strides = [1, 1]} : vector<16x512xf32> to vector<16x128xf32>
    %c0_5 = arith.constant 0 : index
    %c0_6 = arith.constant 0 : index
    %7 = vector.load %arg10[%c0_5, %c0_6] : memref<16x128xf32, #tpu.memory_space<vmem>>, vector<16x128xf32>
    %8 = arith.mulf %6, %7 : vector<16x128xf32>
    %cst_7 = arith.constant dense<0.000000e+00> : vector<16x128xf32>
    %9 = tpu.matmul %0, %8, %cst_7 {dimension_numbers = #tpu.dot_dimension_numbers<[1], [0], [0], [1], [0, 0, 1, 1], [], []>} : vector<16x16xf32>, vector<16x128xf32>, vector<16x128xf32> -> vector<16x128xf32>
    %10 = arith.addf %5, %9 : vector<16x128xf32>
    %cst_8 = arith.constant 0.000000e+00 : f32
    %11 = vector.broadcast %cst_8 : f32 to vector<16x128xf32>
    %12 = arith.cmpf ogt, %10, %11 : vector<16x128xf32>
    %cst_9 = arith.constant 2.000000e-01 : f32
    %13 = vector.broadcast %cst_9 : f32 to vector<16x128xf32>
    %14 = arith.mulf %13, %10 : vector<16x128xf32>
    %15 = arith.select %12, %10, %14 : vector<16x128xi1>, vector<16x128xf32>
    %c0_10 = arith.constant 0 : index
    %c0_11 = arith.constant 0 : index
    %16 = vector.load %arg6[%c0_10, %c0_11] : memref<16x128xf32, #tpu.memory_space<vmem>>, vector<16x128xf32>
    %17 = arith.addf %15, %16 : vector<16x128xf32>
    %cst_12 = arith.constant dense<0xFF800000> : vector<16xf32>
    %18 = vector.multi_reduction <maximumf>, %17, %cst_12 [1] : vector<16x128xf32> to vector<16xf32>
    %19 = vector.shape_cast %18 : vector<16xf32> to vector<16x1xf32>
    %20 = vector.broadcast %19 : vector<16x1xf32> to vector<16x128xf32>
    %21 = arith.subf %17, %20 : vector<16x128xf32>
    %22 = math.exp %21 : vector<16x128xf32>
    %c0_13 = arith.constant 0 : index
    %c0_14 = arith.constant 0 : index
    %23 = vector.load %arg12[%c0_13, %c0_14] : memref<128x128xf32, #tpu.memory_space<vmem>>, vector<128x128xf32>
    %cst_15 = arith.constant dense<0.000000e+00> : vector<16x128xf32>
    %24 = tpu.matmul %22, %23, %cst_15 {dimension_numbers = #tpu.dot_dimension_numbers<[1], [0], [0], [1], [0, 0, 1, 1], [], []>} : vector<16x128xf32>, vector<128x128xf32>, vector<16x128xf32> -> vector<16x128xf32>
    %25 = arith.divf %22, %24 : vector<16x128xf32>
    %26 = tpu.concatenate %4, %4, %4, %4, %4, %4, %4, %4 in 0 : vector<16x256xf32>, vector<16x256xf32>, vector<16x256xf32>, vector<16x256xf32>, vector<16x256xf32>, vector<16x256xf32>, vector<16x256xf32>, vector<16x256xf32> -> vector<128x256xf32>
    %c0_16 = arith.constant 0 : index
    %c0_17 = arith.constant 0 : index
    %27 = vector.load %arg14[%c0_16, %c0_17] : memref<128x256xf32, #tpu.memory_space<vmem>>, vector<128x256xf32>
    %28 = arith.mulf %26, %27 : vector<128x256xf32>
    %cst_18 = arith.constant dense<0.000000e+00> : vector<16x256xf32>
    %29 = tpu.matmul %25, %28, %cst_18 {dimension_numbers = #tpu.dot_dimension_numbers<[1], [0], [0], [1], [0, 0, 1, 1], [], []>} : vector<16x128xf32>, vector<128x256xf32>, vector<16x256xf32> -> vector<16x256xf32>
    %cst_19 = arith.constant 0.000000e+00 : f32
    %30 = vector.broadcast %cst_19 : f32 to vector<16x256xf32>
    %31 = arith.cmpf ogt, %29, %30 : vector<16x256xf32>
    %cst_20 = arith.constant 0.000000e+00 : f32
    %32 = vector.broadcast %cst_20 : f32 to vector<16x256xf32>
    %33 = arith.minimumf %29, %32 : vector<16x256xf32>
    %34 = math.exp %33 : vector<16x256xf32>
    %cst_21 = arith.constant 1.000000e+00 : f32
    %35 = vector.broadcast %cst_21 : f32 to vector<16x256xf32>
    %36 = arith.subf %34, %35 : vector<16x256xf32>
    %37 = arith.select %31, %29, %36 : vector<16x256xi1>, vector<16x256xf32>
    %c0_22 = arith.constant 0 : index
    %c0_23 = arith.constant 0 : index
    %38 = vector.load %arg3[%c0_22, %c0_23] : memref<256x64xf32, #tpu.memory_space<vmem>>, vector<256x64xf32>
    %cst_24 = arith.constant dense<0.000000e+00> : vector<16x64xf32>
    %39 = tpu.matmul %37, %38, %cst_24 {dimension_numbers = #tpu.dot_dimension_numbers<[1], [0], [0], [1], [0, 0, 1, 1], [], []>} : vector<16x256xf32>, vector<256x64xf32>, vector<16x64xf32> -> vector<16x64xf32>
    %40 = vector.extract_strided_slice %39 {offsets = [0, 0], sizes = [16, 32], strides = [1, 1]} : vector<16x64xf32> to vector<16x32xf32>
    %41 = vector.extract_strided_slice %39 {offsets = [0, 32], sizes = [16, 16], strides = [1, 1]} : vector<16x64xf32> to vector<16x16xf32>
    %42 = vector.extract_strided_slice %39 {offsets = [0, 48], sizes = [16, 16], strides = [1, 1]} : vector<16x64xf32> to vector<16x16xf32>
    %c0_25 = arith.constant 0 : index
    %c0_26 = arith.constant 0 : index
    %43 = vector.load %arg11[%c0_25, %c0_26] : memref<16x16xf32, #tpu.memory_space<vmem>>, vector<16x16xf32>
    %44 = arith.mulf %42, %43 : vector<16x16xf32>
    %cst_27 = arith.constant dense<0.000000e+00> : vector<16x16xf32>
    %45 = tpu.matmul %0, %44, %cst_27 {dimension_numbers = #tpu.dot_dimension_numbers<[1], [0], [0], [1], [0, 0, 1, 1], [], []>} : vector<16x16xf32>, vector<16x16xf32>, vector<16x16xf32> -> vector<16x16xf32>
    %46 = arith.addf %41, %45 : vector<16x16xf32>
    %cst_28 = arith.constant 0.000000e+00 : f32
    %47 = vector.broadcast %cst_28 : f32 to vector<16x16xf32>
    %48 = arith.cmpf ogt, %46, %47 : vector<16x16xf32>
    %cst_29 = arith.constant 2.000000e-01 : f32
    %49 = vector.broadcast %cst_29 : f32 to vector<16x16xf32>
    %50 = arith.mulf %49, %46 : vector<16x16xf32>
    %51 = arith.select %48, %46, %50 : vector<16x16xi1>, vector<16x16xf32>
    %c0_30 = arith.constant 0 : index
    %c0_31 = arith.constant 0 : index
    %52 = vector.load %arg7[%c0_30, %c0_31] : memref<16x16xf32, #tpu.memory_space<vmem>>, vector<16x16xf32>
    %53 = arith.addf %51, %52 : vector<16x16xf32>
    %cst_32 = arith.constant dense<0xFF800000> : vector<16xf32>
    %54 = vector.multi_reduction <maximumf>, %53, %cst_32 [1] : vector<16x16xf32> to vector<16xf32>
    %55 = vector.shape_cast %54 : vector<16xf32> to vector<16x1xf32>
    %56 = vector.broadcast %55 : vector<16x1xf32> to vector<16x16xf32>
    %57 = arith.subf %53, %56 : vector<16x16xf32>
    %58 = math.exp %57 : vector<16x16xf32>
    %c0_33 = arith.constant 0 : index
    %c0_34 = arith.constant 0 : index
    %59 = vector.load %arg13[%c0_33, %c0_34] : memref<16x16xf32, #tpu.memory_space<vmem>>, vector<16x16xf32>
    %cst_35 = arith.constant dense<0.000000e+00> : vector<16x16xf32>
    %60 = tpu.matmul %58, %59, %cst_35 {dimension_numbers = #tpu.dot_dimension_numbers<[1], [0], [0], [1], [0, 0, 1, 1], [], []>} : vector<16x16xf32>, vector<16x16xf32>, vector<16x16xf32> -> vector<16x16xf32>
    %61 = arith.divf %58, %60 : vector<16x16xf32>
    %cst_36 = arith.constant dense<0.000000e+00> : vector<16x32xf32>
    %62 = tpu.matmul %61, %40, %cst_36 {dimension_numbers = #tpu.dot_dimension_numbers<[1], [0], [0], [1], [0, 0, 1, 1], [], []>} : vector<16x16xf32>, vector<16x32xf32>, vector<16x32xf32> -> vector<16x32xf32>
    %cst_37 = arith.constant 0.000000e+00 : f32
    %63 = vector.broadcast %cst_37 : f32 to vector<16x32xf32>
    %64 = arith.cmpf ogt, %62, %63 : vector<16x32xf32>
    %cst_38 = arith.constant 0.000000e+00 : f32
    %65 = vector.broadcast %cst_38 : f32 to vector<16x32xf32>
    %66 = arith.minimumf %62, %65 : vector<16x32xf32>
    %67 = math.exp %66 : vector<16x32xf32>
    %cst_39 = arith.constant 1.000000e+00 : f32
    %68 = vector.broadcast %cst_39 : f32 to vector<16x32xf32>
    %69 = arith.subf %67, %68 : vector<16x32xf32>
    %70 = arith.select %64, %62, %69 : vector<16x32xi1>, vector<16x32xf32>
    %c0_40 = arith.constant 0 : index
    %c0_41 = arith.constant 0 : index
    %71 = vector.load %arg4[%c0_40, %c0_41] : memref<32x512xf32, #tpu.memory_space<vmem>>, vector<32x512xf32>
    %cst_42 = arith.constant dense<0.000000e+00> : vector<16x512xf32>
    %72 = tpu.matmul %70, %71, %cst_42 {dimension_numbers = #tpu.dot_dimension_numbers<[1], [0], [0], [1], [0, 0, 1, 1], [], []>} : vector<16x32xf32>, vector<32x512xf32>, vector<16x512xf32> -> vector<16x512xf32>
    %73 = vector.extract_strided_slice %72 {offsets = [0, 0], sizes = [16, 256], strides = [1, 1]} : vector<16x512xf32> to vector<16x256xf32>
    %74 = vector.extract_strided_slice %72 {offsets = [0, 256], sizes = [16, 128], strides = [1, 1]} : vector<16x512xf32> to vector<16x128xf32>
    %75 = vector.extract_strided_slice %72 {offsets = [0, 384], sizes = [16, 128], strides = [1, 1]} : vector<16x512xf32> to vector<16x128xf32>
    %c0_43 = arith.constant 0 : index
    %c0_44 = arith.constant 0 : index
    %76 = vector.load %arg10[%c0_43, %c0_44] : memref<16x128xf32, #tpu.memory_space<vmem>>, vector<16x128xf32>
    %77 = arith.mulf %75, %76 : vector<16x128xf32>
    %cst_45 = arith.constant dense<0.000000e+00> : vector<16x128xf32>
    %78 = tpu.matmul %0, %77, %cst_45 {dimension_numbers = #tpu.dot_dimension_numbers<[1], [0], [0], [1], [0, 0, 1, 1], [], []>} : vector<16x16xf32>, vector<16x128xf32>, vector<16x128xf32> -> vector<16x128xf32>
    %79 = arith.addf %74, %78 : vector<16x128xf32>
    %cst_46 = arith.constant 0.000000e+00 : f32
    %80 = vector.broadcast %cst_46 : f32 to vector<16x128xf32>
    %81 = arith.cmpf ogt, %79, %80 : vector<16x128xf32>
    %cst_47 = arith.constant 2.000000e-01 : f32
    %82 = vector.broadcast %cst_47 : f32 to vector<16x128xf32>
    %83 = arith.mulf %82, %79 : vector<16x128xf32>
    %84 = arith.select %81, %79, %83 : vector<16x128xi1>, vector<16x128xf32>
    %c0_48 = arith.constant 0 : index
    %c0_49 = arith.constant 0 : index
    %85 = vector.load %arg8[%c0_48, %c0_49] : memref<16x128xf32, #tpu.memory_space<vmem>>, vector<16x128xf32>
    %86 = arith.addf %84, %85 : vector<16x128xf32>
    %cst_50 = arith.constant dense<0xFF800000> : vector<16xf32>
    %87 = vector.multi_reduction <maximumf>, %86, %cst_50 [1] : vector<16x128xf32> to vector<16xf32>
    %88 = vector.shape_cast %87 : vector<16xf32> to vector<16x1xf32>
    %89 = vector.broadcast %88 : vector<16x1xf32> to vector<16x128xf32>
    %90 = arith.subf %86, %89 : vector<16x128xf32>
    %91 = math.exp %90 : vector<16x128xf32>
    %c0_51 = arith.constant 0 : index
    %c0_52 = arith.constant 0 : index
    %92 = vector.load %arg12[%c0_51, %c0_52] : memref<128x128xf32, #tpu.memory_space<vmem>>, vector<128x128xf32>
    %cst_53 = arith.constant dense<0.000000e+00> : vector<16x128xf32>
    %93 = tpu.matmul %91, %92, %cst_53 {dimension_numbers = #tpu.dot_dimension_numbers<[1], [0], [0], [1], [0, 0, 1, 1], [], []>} : vector<16x128xf32>, vector<128x128xf32>, vector<16x128xf32> -> vector<16x128xf32>
    %94 = arith.divf %91, %93 : vector<16x128xf32>
    %95 = tpu.concatenate %73, %73, %73, %73, %73, %73, %73, %73 in 0 : vector<16x256xf32>, vector<16x256xf32>, vector<16x256xf32>, vector<16x256xf32>, vector<16x256xf32>, vector<16x256xf32>, vector<16x256xf32>, vector<16x256xf32> -> vector<128x256xf32>
    %c0_54 = arith.constant 0 : index
    %c0_55 = arith.constant 0 : index
    %96 = vector.load %arg14[%c0_54, %c0_55] : memref<128x256xf32, #tpu.memory_space<vmem>>, vector<128x256xf32>
    %97 = arith.mulf %95, %96 : vector<128x256xf32>
    %cst_56 = arith.constant dense<0.000000e+00> : vector<16x256xf32>
    %98 = tpu.matmul %94, %97, %cst_56 {dimension_numbers = #tpu.dot_dimension_numbers<[1], [0], [0], [1], [0, 0, 1, 1], [], []>} : vector<16x128xf32>, vector<128x256xf32>, vector<16x256xf32> -> vector<16x256xf32>
    %cst_57 = arith.constant 0.000000e+00 : f32
    %99 = vector.broadcast %cst_57 : f32 to vector<16x256xf32>
    %100 = arith.cmpf ogt, %98, %99 : vector<16x256xf32>
    %cst_58 = arith.constant 0.000000e+00 : f32
    %101 = vector.broadcast %cst_58 : f32 to vector<16x256xf32>
    %102 = arith.minimumf %98, %101 : vector<16x256xf32>
    %103 = math.exp %102 : vector<16x256xf32>
    %cst_59 = arith.constant 1.000000e+00 : f32
    %104 = vector.broadcast %cst_59 : f32 to vector<16x256xf32>
    %105 = arith.subf %103, %104 : vector<16x256xf32>
    %106 = arith.select %100, %98, %105 : vector<16x256xi1>, vector<16x256xf32>
    %c0_60 = arith.constant 0 : index
    %c0_61 = arith.constant 0 : index
    %107 = vector.load %arg5[%c0_60, %c0_61] : memref<256x64xf32, #tpu.memory_space<vmem>>, vector<256x64xf32>
    %cst_62 = arith.constant dense<0.000000e+00> : vector<16x64xf32>
    %108 = tpu.matmul %106, %107, %cst_62 {dimension_numbers = #tpu.dot_dimension_numbers<[1], [0], [0], [1], [0, 0, 1, 1], [], []>} : vector<16x256xf32>, vector<256x64xf32>, vector<16x64xf32> -> vector<16x64xf32>
    %109 = vector.extract_strided_slice %108 {offsets = [0, 0], sizes = [16, 32], strides = [1, 1]} : vector<16x64xf32> to vector<16x32xf32>
    %110 = vector.extract_strided_slice %108 {offsets = [0, 32], sizes = [16, 16], strides = [1, 1]} : vector<16x64xf32> to vector<16x16xf32>
    %111 = vector.extract_strided_slice %108 {offsets = [0, 48], sizes = [16, 16], strides = [1, 1]} : vector<16x64xf32> to vector<16x16xf32>
    %c0_63 = arith.constant 0 : index
    %c0_64 = arith.constant 0 : index
    %112 = vector.load %arg11[%c0_63, %c0_64] : memref<16x16xf32, #tpu.memory_space<vmem>>, vector<16x16xf32>
    %113 = arith.mulf %111, %112 : vector<16x16xf32>
    %cst_65 = arith.constant dense<0.000000e+00> : vector<16x16xf32>
    %114 = tpu.matmul %0, %113, %cst_65 {dimension_numbers = #tpu.dot_dimension_numbers<[1], [0], [0], [1], [0, 0, 1, 1], [], []>} : vector<16x16xf32>, vector<16x16xf32>, vector<16x16xf32> -> vector<16x16xf32>
    %115 = arith.addf %110, %114 : vector<16x16xf32>
    %cst_66 = arith.constant 0.000000e+00 : f32
    %116 = vector.broadcast %cst_66 : f32 to vector<16x16xf32>
    %117 = arith.cmpf ogt, %115, %116 : vector<16x16xf32>
    %cst_67 = arith.constant 2.000000e-01 : f32
    %118 = vector.broadcast %cst_67 : f32 to vector<16x16xf32>
    %119 = arith.mulf %118, %115 : vector<16x16xf32>
    %120 = arith.select %117, %115, %119 : vector<16x16xi1>, vector<16x16xf32>
    %c0_68 = arith.constant 0 : index
    %c0_69 = arith.constant 0 : index
    %121 = vector.load %arg9[%c0_68, %c0_69] : memref<16x16xf32, #tpu.memory_space<vmem>>, vector<16x16xf32>
    %122 = arith.addf %120, %121 : vector<16x16xf32>
    %cst_70 = arith.constant dense<0xFF800000> : vector<16xf32>
    %123 = vector.multi_reduction <maximumf>, %122, %cst_70 [1] : vector<16x16xf32> to vector<16xf32>
    %124 = vector.shape_cast %123 : vector<16xf32> to vector<16x1xf32>
    %125 = vector.broadcast %124 : vector<16x1xf32> to vector<16x16xf32>
    %126 = arith.subf %122, %125 : vector<16x16xf32>
    %127 = math.exp %126 : vector<16x16xf32>
    %c0_71 = arith.constant 0 : index
    %c0_72 = arith.constant 0 : index
    %128 = vector.load %arg13[%c0_71, %c0_72] : memref<16x16xf32, #tpu.memory_space<vmem>>, vector<16x16xf32>
    %cst_73 = arith.constant dense<0.000000e+00> : vector<16x16xf32>
    %129 = tpu.matmul %127, %128, %cst_73 {dimension_numbers = #tpu.dot_dimension_numbers<[1], [0], [0], [1], [0, 0, 1, 1], [], []>} : vector<16x16xf32>, vector<16x16xf32>, vector<16x16xf32> -> vector<16x16xf32>
    %130 = arith.divf %127, %129 : vector<16x16xf32>
    %cst_74 = arith.constant dense<0.000000e+00> : vector<16x32xf32>
    %131 = tpu.matmul %130, %109, %cst_74 {dimension_numbers = #tpu.dot_dimension_numbers<[1], [0], [0], [1], [0, 0, 1, 1], [], []>} : vector<16x16xf32>, vector<16x32xf32>, vector<16x32xf32> -> vector<16x32xf32>
    %cst_75 = arith.constant 0.000000e+00 : f32
    %132 = vector.broadcast %cst_75 : f32 to vector<16x32xf32>
    %133 = arith.cmpf ogt, %131, %132 : vector<16x32xf32>
    %cst_76 = arith.constant 0.000000e+00 : f32
    %134 = vector.broadcast %cst_76 : f32 to vector<16x32xf32>
    %135 = arith.minimumf %131, %134 : vector<16x32xf32>
    %136 = math.exp %135 : vector<16x32xf32>
    %cst_77 = arith.constant 1.000000e+00 : f32
    %137 = vector.broadcast %cst_77 : f32 to vector<16x32xf32>
    %138 = arith.subf %136, %137 : vector<16x32xf32>
    %139 = arith.select %133, %131, %138 : vector<16x32xi1>, vector<16x32xf32>
    %cst_78 = arith.constant dense<0.000000e+00> : vector<32xf32>
    %140 = vector.multi_reduction <add>, %139, %cst_78 [0] : vector<16x32xf32> to vector<32xf32>
    %141 = vector.shape_cast %140 : vector<32xf32> to vector<1x32xf32>
    %cst_79 = arith.constant 1.600000e+01 : f32
    %142 = vector.broadcast %cst_79 : f32 to vector<1x32xf32>
    %143 = arith.divf %141, %142 : vector<1x32xf32>
    %c0_80 = arith.constant 0 : index
    %c0_81 = arith.constant 0 : index
    %c0_82 = arith.constant 0 : index
    %144 = vector.load %arg16[%c0_80, %c0_81, %c0_82] : memref<1x1x32xf32, #tpu.memory_space<vmem>>, vector<1x1x32xf32>
    %145 = vector.shape_cast %144 : vector<1x1x32xf32> to vector<1x32xf32>
    %146 = vector.shape_cast %143 : vector<1x32xf32> to vector<1x1x32xf32>
    tpu.vector_store %arg16[%c0_80, %c0_81, %c0_82], %146 {strides = array<i32>} : memref<1x1x32xf32, #tpu.memory_space<vmem>>, vector<1x1x32xf32>,
    return
  }
  func.func @transform_0(%arg0: i32) -> (i32, i32) {
    %c0_i32 = arith.constant 0 : i32
    %c0_i32_0 = arith.constant 0 : i32
    return %arg0, %c0_i32 : i32, i32
  }
  func.func @transform_1(%arg0: i32) -> (i32, i32) {
    %c0_i32 = arith.constant 0 : i32
    %c0_i32_0 = arith.constant 0 : i32
    %c0_i32_1 = arith.constant 0 : i32
    return %c0_i32, %c0_i32_0 : i32, i32
  }
  func.func @transform_2(%arg0: i32) -> (i32, i32) {
    %c0_i32 = arith.constant 0 : i32
    %c0_i32_0 = arith.constant 0 : i32
    %c0_i32_1 = arith.constant 0 : i32
    return %c0_i32, %c0_i32_0 : i32, i32
  }
  func.func @transform_3(%arg0: i32) -> (i32, i32) {
    %c0_i32 = arith.constant 0 : i32
    %c0_i32_0 = arith.constant 0 : i32
    %c0_i32_1 = arith.constant 0 : i32
    return %c0_i32, %c0_i32_0 : i32, i32
  }
  func.func @transform_4(%arg0: i32) -> (i32, i32) {
    %c0_i32 = arith.constant 0 : i32
    %c0_i32_0 = arith.constant 0 : i32
    %c0_i32_1 = arith.constant 0 : i32
    return %c0_i32, %c0_i32_0 : i32, i32
  }
  func.func @transform_5(%arg0: i32) -> (i32, i32) {
    %c0_i32 = arith.constant 0 : i32
    %c0_i32_0 = arith.constant 0 : i32
    %c0_i32_1 = arith.constant 0 : i32
    return %c0_i32, %c0_i32_0 : i32, i32
  }
  func.func @transform_6(%arg0: i32) -> (i32, i32) {
    %c0_i32 = arith.constant 0 : i32
    %c0_i32_0 = arith.constant 0 : i32
    %c0_i32_1 = arith.constant 0 : i32
    return %c0_i32, %c0_i32_0 : i32, i32
  }
  func.func @transform_7(%arg0: i32) -> (i32, i32) {
    %c0_i32 = arith.constant 0 : i32
    %c0_i32_0 = arith.constant 0 : i32
    %c0_i32_1 = arith.constant 0 : i32
    return %c0_i32, %c0_i32_0 : i32, i32
  }
  func.func @transform_8(%arg0: i32) -> (i32, i32) {
    %c0_i32 = arith.constant 0 : i32
    %c0_i32_0 = arith.constant 0 : i32
    %c0_i32_1 = arith.constant 0 : i32
    return %c0_i32, %c0_i32_0 : i32, i32
  }
  func.func @transform_9(%arg0: i32) -> (i32, i32) {
    %c0_i32 = arith.constant 0 : i32
    %c0_i32_0 = arith.constant 0 : i32
    %c0_i32_1 = arith.constant 0 : i32
    return %c0_i32, %c0_i32_0 : i32, i32
  }
  func.func @transform_10(%arg0: i32) -> (i32, i32) {
    %c0_i32 = arith.constant 0 : i32
    %c0_i32_0 = arith.constant 0 : i32
    %c0_i32_1 = arith.constant 0 : i32
    return %c0_i32, %c0_i32_0 : i32, i32
  }
  func.func @transform_11(%arg0: i32) -> (i32, i32) {
    %c0_i32 = arith.constant 0 : i32
    %c0_i32_0 = arith.constant 0 : i32
    %c0_i32_1 = arith.constant 0 : i32
    return %c0_i32, %c0_i32_0 : i32, i32
  }
  func.func @transform_12(%arg0: i32) -> (i32, i32) {
    %c0_i32 = arith.constant 0 : i32
    %c0_i32_0 = arith.constant 0 : i32
    %c0_i32_1 = arith.constant 0 : i32
    return %c0_i32, %c0_i32_0 : i32, i32
  }
  func.func @transform_13(%arg0: i32) -> (i32, i32) {
    %c0_i32 = arith.constant 0 : i32
    %c0_i32_0 = arith.constant 0 : i32
    %c0_i32_1 = arith.constant 0 : i32
    return %c0_i32, %c0_i32_0 : i32, i32
  }
  func.func @transform_14(%arg0: i32) -> (i32, i32) {
    %c0_i32 = arith.constant 0 : i32
    %c0_i32_0 = arith.constant 0 : i32
    %c0_i32_1 = arith.constant 0 : i32
    return %c0_i32, %c0_i32_0 : i32, i32
  }
  func.func @transform_15(%arg0: i32) -> (i32, i32, i32) {
    %c0_i32 = arith.constant 0 : i32
    %c0_i32_0 = arith.constant 0 : i32
    %c0_i32_1 = arith.constant 0 : i32
    return %arg0, %c0_i32, %c0_i32_0 : i32, i32, i32
  }
}

</mosaic_0001>

<bundles_post_ra>
// kernel: tpu_custom_call.1
= control target key start
LH: loop header
LB: loop body
LE: loop exit
PB: predicated region body
PF: predicated region fallthrough
CT: control target
= control target key end

     0   :  { %s4717_s0 = inlined_call_operand.hbm [shape: f32[32,32], index: 0, kind: input, shape index: {}]   ;;  %s4718_s1 = inlined_call_operand.vmem [shape: f32[32,512], index: 1, kind: input, shape index: {}]   ;;  %s4719_s2 = inlined_call_operand.vmem [shape: f32[256,64], index: 2, kind: input, shape index: {}]   ;;  %s4720_s3 = inlined_call_operand.vmem [shape: f32[32,512], index: 3, kind: input, shape index: {}]   ;;  %s4721_s4 = inlined_call_operand.vmem [shape: f32[256,64], index: 4, kind: input, shape index: {}]   ;;  %s4722_s5 = inlined_call_operand.hbm [shape: f32[16,128], index: 5, kind: input, shape index: {}]   ;;  %s4723_s6 = inlined_call_operand.hbm [shape: f32[16,16], index: 6, kind: input, shape index: {}]   ;;  %s4724_s7 = inlined_call_operand.hbm [shape: f32[16,128], index: 7, kind: input, shape index: {}]   ;;  %s4725_s8 = inlined_call_operand.hbm [shape: f32[16,16], index: 8, kind: input, shape index: {}]   ;;  %s4726_s9 = inlined_call_operand.hbm [shape: f32[16,128], index: 9, kind: input, shape index: {}]   ;;  %s4727_s10 = inlined_call_operand.vmem [shape: f32[16,16], index: 10, kind: input, shape index: {}]   ;;  %s4728_s11 = inlined_call_operand.vmem [shape: f32[128,128], index: 11, kind: input, shape index: {}]   ;;  %s4729_s12 = inlined_call_operand.hbm [shape: f32[16,16], index: 12, kind: input, shape index: {}]   ;;  %s4730_s13 = inlined_call_operand.vmem [shape: f32[128,256], index: 13, kind: input, shape index: {}]   ;;  %s4731_s14 = inlined_call_operand.hbm [shape: f32[16,16], index: 14, kind: input, shape index: {}]   ;;  %s4732_s15 = inlined_call_operand.hbm [shape: f32[2,1,32], index: 15, kind: output, shape index: {}]  }
   0x1   :  { %4757 = sst [smem:[#allocation35_spill]] %s4721_s4 }
   0x2   :  { %4758 = sst [smem:[#allocation36_spill]] %s4722_s5 }
   0x3   :  { %4759 = sst [smem:[#allocation37_spill]] %s4723_s6 }
   0x4   :  { %4760 = sst [smem:[#allocation38_spill]] %s4724_s7 }
   0x5   :  { %4761 = sst [smem:[#allocation39_spill]] %s4725_s8 }
   0x6   :  { %4762 = sst [smem:[#allocation40_spill]] %s4726_s9 }
   0x7   :  { %4763 = sst [smem:[#allocation41_spill]] %s4729_s12 }
   0x8   :  { %4764 = sst [smem:[#allocation42_spill]] %s4731_s14 }
   0x9   :  { %4765 = sst [smem:[#allocation43_spill]] %s4732_s15 }
   0xa   :  { %20 = vsyncpa [#allocation3], 0 }
   0xb   :  { %22 = vsyncpa [#allocation3 + $0x1], 0 }
   0xc   :  { %23 = vsyncpa [#allocation6], 0 }
   0xd   :  { %24 = vsyncpa [#allocation9], 0 }
   0xe   :  { %25 = vsyncpa [#allocation12], 0 }
   0xf   :  { %26 = vsyncpa [#allocation15], 0 }
  0x10   :  { %27 = vsyncpa [#allocation4], 0 }
  0x11   :  { %29 = vsyncpa [#allocation4 + $0x1], 0  ;;  %s3577_s18 = smov 0   ;;  %s3579_s19 = smov 0  }
  0x12   :  { %s3581_s20 = smov 0   ;;  %s3583_s21 = smov 0  }
  0x13 LB: > { %s3481_s22 = smov [#allocation5]   ;;  %s3598_s24 = sadd.s32 4294967295, %s3479_s21   ;;  %s3479_s21 = sphi %s3583_s21, %s4825_s21   ;;  %s3475_s20 = sphi %s3581_s20, %s4824_s20   ;;  %s3471_s19 = sphi %s3579_s19, %s4823_s19   ;;  %s3467_s18 = sphi %s3577_s18, %s4822_s18  }
  0x14   : > { %s410_s23 = sshll.u32 %s3481_s22, 4  ;;  %p2676_p0 = scmp.ge.s32.totalorder %s3479_s21, 1  ;;  %s411_s23 = int_to_ptr.vmem [resolvable:$true] %s410_s23 }
  0x15   : > { %p4737_p1 = scmp.eq.s32.totalorder %s3598_s24, 0  ;;  %p386_p2 = scmp.lt.s32.totalorder %s3479_s21, 3 }
  0x16   : > { %s3482_s26 = smov [#allocation8]   ;;  %s3483_s29 = smov [#allocation11]  }
  0x17   : > { %p3603_p3 = pnand %p2676_p0, %p386_p2  ;;  %s436_s27 = sshll.u32 %s3482_s26, 4  ;;  %s3616_s27 = int_to_ptr.vmem [resolvable:$true] %s436_s27 }
  0x18   : > { %s462_s30 = sshll.u32 %s3483_s29, 4  ;;  %s3200_s17 = scalar_lea.vmem %s411_s23, 256  ;;  %s3618_s30 = int_to_ptr.vmem [resolvable:$true] %s462_s30 }
  0x19   : > { %s4766_s25 = scalar_select %p3603_p3, 1, 0 }
  0x1a   : > { %p3039_p5 = pneg %p3603_p3  ;;  %p3201_p8 = scmp.ne.s32.totalorder %s411_s23, %s3200_s17 }
  0x1b   : > { %p3208_p11 = scmp.lt.s32.totalorder %s411_s23, %s411_s23  ;;  %p3209_p12 = scmp.lt.s32.totalorder %s3200_s17, %s3200_s17 }
  0x1c   : > { %p3612_p6 = pnand %p3039_p5, %p4737_p1 }
  0x1d   : > { %p3210_p13 = por %p3209_p12, %p3208_p11 }
  0x1e   : > { %p3622_p7 = pneg %p3612_p6 }
  0x20   : > { %p3203_p9 = pnand %p3201_p8, %p3622_p7 }
  0x22   : > { %p3204_p10 = pneg %p3203_p9 }
  0x24   : > { %p3211_p0 = pnand %p3210_p13, %p3204_p10 }
  0x26   : > { %3214 = shalt.err (!%p3211_p0)
}
  0x27   : > { %s4735_s22 = smov 128   ;;  %s4736_s26 = smov 8  }
  0x28   : > { %s4769_s5 = sld [smem:[#allocation36_spill]]  ;;  %s3226_s4 = scalar_lea.vmem %s3616_s27, 256 }
  0x29   : > { %p3227_p2 = scmp.ne.s32.totalorder %s3616_s27, %s3226_s4  ;;  %p3234_p9 = scmp.lt.s32.totalorder %s3616_s27, %s3616_s27 }
  0x2a   : > { %p3235_p10 = scmp.lt.s32.totalorder %s3226_s4, %s3226_s4 }
  0x2b   : > { %p3229_p5 = pnand %p3227_p2, %p3622_p7 }
  0x2c   : > { %p3236_p11 = por %p3235_p10, %p3234_p9 }
  0x2d   : > { %p3230_p8 = pneg %p3229_p5 }
  0x2e   : > { %3042 = dma.hbm_to_vmem [thread:$0]  (!%p3612_p6), %s4769_s5, 256, %s411_s23, [#allocation6], %s4735_s22, %s4735_s22, %s4736_s26  }
  0x2f   : > { %p3237_p12 = pnand %p3236_p11, %p3230_p8 }
  0x31   : > { %3240 = shalt.err (!%p3237_p12)
}
  0x32   : > { %s4770_s7 = sld [smem:[#allocation38_spill]]  ;;  %s3252_s23 = scalar_lea.vmem %s3618_s30, 256 }
  0x33   : > { %p3253_p13 = scmp.ne.s32.totalorder %s3618_s30, %s3252_s23  ;;  %p3260_p5 = scmp.lt.s32.totalorder %s3618_s30, %s3618_s30 }
  0x34   : > { %p3261_p8 = scmp.lt.s32.totalorder %s3252_s23, %s3252_s23 }
  0x35   : > { %p3255_p0 = pnand %p3253_p13, %p3622_p7 }
  0x36   : > { %p3262_p9 = por %p3261_p8, %p3260_p5 }
  0x37   : > { %p3256_p2 = pneg %p3255_p0 }
  0x38   : > { %3048 = dma.hbm_to_vmem [thread:$0]  (!%p3612_p6), %s4770_s7, 256, %s3616_s27, [#allocation9], %s4735_s22, %s4735_s22, %s4736_s26  }
  0x39   : > { %p3263_p10 = pnand %p3262_p9, %p3256_p2 }
  0x3b   : > { %3266 = shalt.err (!%p3263_p10)
}
  0x3c   : > { %s4771_s9 = sld [smem:[#allocation40_spill]]  ;;  %s3486_s27 = smov [#allocation7]  }
  0x3d   : > { %s423_s17 = sshll.u32 %s3486_s27, 4  ;;  %s3487_s15 = smov [#allocation10]   ;;  %s424_s17 = int_to_ptr.vmem [resolvable:$true] %s423_s17 }
  0x3e   : > { %s449_s5 = sshll.u32 %s3487_s15, 4  ;;  %s3278_s23 = scalar_lea.vmem %s424_s17, 256  ;;  %s450_s5 = int_to_ptr.vmem [resolvable:$true] %s449_s5 }
  0x3f   : > { %p3279_p11 = scmp.ne.s32.totalorder %s424_s17, %s3278_s23  ;;  %p3286_p0 = scmp.lt.s32.totalorder %s424_s17, %s424_s17 }
  0x40   : > { %p3287_p2 = scmp.lt.s32.totalorder %s3278_s23, %s3278_s23 }
  0x41   : > { %p3281_p12 = pnand %p3279_p11, %p3622_p7 }
  0x42   : > { %3054 = dma.hbm_to_vmem [thread:$0]  (!%p3612_p6), %s4771_s9, 256, %s3618_s30, [#allocation12], %s4735_s22, %s4735_s22, %s4736_s26  }
  0x43   : > { %p3282_p13 = pneg %p3281_p12  ;;  %p3288_p5 = por %p3287_p2, %p3286_p0 }
  0x45   : > { %p3289_p8 = pnand %p3288_p5, %p3282_p13 }
  0x47   : > { %3292 = shalt.err (!%p3289_p8)
}
  0x48   : > { %s4772_s6 = sld [smem:[#allocation37_spill]]  ;;  %s3304_s29 = scalar_lea.vmem %s450_s5, 256 }
  0x49   : > { %p3305_p9 = scmp.ne.s32.totalorder %s450_s5, %s3304_s29  ;;  %p3312_p12 = scmp.lt.s32.totalorder %s450_s5, %s450_s5 }
  0x4a   : > { %p3313_p0 = scmp.lt.s32.totalorder %s3304_s29, %s3304_s29 }
  0x4b   : > { %p3307_p10 = pnand %p3305_p9, %p3622_p7 }
  0x4c   : > { %p3314_p13 = por %p3313_p0, %p3312_p12 }
  0x4d   : > { %p3308_p11 = pneg %p3307_p10 }
  0x4e   : > { %3045 = dma.hbm_to_vmem [thread:$0]  (!%p3612_p6), %s4772_s6, 256, %s424_s17, [#allocation6], %s4735_s22, %s4735_s22, %s4736_s26  }
  0x4f   : > { %p3315_p2 = pnand %p3314_p13, %p3308_p11 }
  0x51   : > { %3318 = shalt.err (!%p3315_p2)
}
  0x52   : > { %s4773_s8 = sld [smem:[#allocation39_spill]]  ;;  %s3488_s17 = smov [#allocation13]  }
  0x53   : > { %s481_s23 = sshll.u32 %s3488_s17, 4  ;;  %s3489_s30 = smov [#allocation14]   ;;  %s482_s23 = int_to_ptr.vmem [resolvable:$true] %s481_s23 }
  0x54   : > { %s497_s4 = sshll.u32 %s3489_s30, 4  ;;  %s3330_s6 = scalar_lea.vmem %s482_s23, 256  ;;  %s498_s4 = int_to_ptr.vmem [resolvable:$true] %s497_s4 }
  0x55   : > { %p3331_p5 = scmp.ne.s32.totalorder %s482_s23, %s3330_s6  ;;  %p3338_p10 = scmp.lt.s32.totalorder %s482_s23, %s482_s23 }
  0x56   : > { %p3339_p11 = scmp.lt.s32.totalorder %s3330_s6, %s3330_s6 }
  0x57   : > { %p3333_p8 = pnand %p3331_p5, %p3622_p7 }
  0x58   : > { %3051 = dma.hbm_to_vmem [thread:$0]  (!%p3612_p6), %s4773_s8, 256, %s450_s5, [#allocation9], %s4735_s22, %s4735_s22, %s4736_s26  }
  0x59   : > { %p3334_p9 = pneg %p3333_p8  ;;  %p3340_p12 = por %p3339_p11, %p3338_p10 }
  0x5b   : > { %p3341_p0 = pnand %p3340_p12, %p3334_p9 }
  0x5d   : > { %3344 = shalt.err (!%p3341_p0)
}
  0x5e   : > { %s4774_s12 = sld [smem:[#allocation41_spill]]  ;;  %s3356_s27 = scalar_lea.vmem %s498_s4, 256 }
  0x5f   : > { %p3357_p13 = scmp.ne.s32.totalorder %s498_s4, %s3356_s27  ;;  %p3364_p8 = scmp.lt.s32.totalorder %s498_s4, %s498_s4 }
  0x60   : > { %p3365_p10 = scmp.lt.s32.totalorder %s3356_s27, %s3356_s27 }
  0x61   : > { %p3359_p2 = pnand %p3357_p13, %p3622_p7 }
  0x62   : > { %p3366_p9 = por %p3365_p10, %p3364_p8 }
  0x63   : > { %p3360_p5 = pneg %p3359_p2 }
  0x64   : > { %3057 = dma.hbm_to_vmem [thread:$0]  (!%p3612_p6), %s4774_s12, 256, %s482_s23, [#allocation12], %s4735_s22, %s4735_s22, %s4736_s26  }
  0x65   : > { %p3367_p11 = pnand %p3366_p9, %p3360_p5 }
  0x67   : > { %3370 = shalt.err (!%p3367_p11)
}
  0x68   : > { %s4775_s14 = sld [smem:[#allocation42_spill]]  ;;  %s2675_s28 = sadd.s32 4294967294, %s3479_s21  }
  0x69   : > { %s3708_s16 = sadd.s32 1, %s3479_s21   ;;  %s42_s17 = sadd.s32 1, %s3475_s20 }
  0x6a   : > { %s39_s23 = ssub.s32 %s3479_s21, %s3708_s16  ;;  %p49_p7 = scmp.ne.s32.totalorder %s3475_s20, %s3471_s19 }
  0x6b   : > { %p40_p12 = scmp.eq.s32.totalorder %s39_s23, 0  ;;  %p50_p0 = scmp.eq.s32.totalorder %s3479_s21, 0 }
  0x6c   : > { %p55_p13 = scmp.ne.s32.totalorder %s3471_s19, %s3467_s18  ;;  %p373_p2 = scmp.eq.s32.totalorder %s3598_s24, 1 }
  0x6d   : > { %s3720_s30 = scalar_select %p40_p12, %s3475_s20, %s42_s17  }
  0x6e   : > { %3060 = dma.hbm_to_vmem [thread:$0]  (!%p3612_p6), %s4775_s14, 256, %s498_s4, [#allocation15], %s4735_s22, %s4735_s22, %s4736_s26  }
  0x6f   : > { %p51_p5 = por %p50_p0, %p49_p7  ;;  %p3724_p8 = por %p4737_p1, %p55_p13 }
  0x70   : > { %p3728_p6 = por %p373_p2, %p49_p7  ;;  %p379_p10 = scmp.eq.s32.totalorder %s2675_s28, 1 }
  0x71   : > { %s4776_s5 = scalar_select %p3724_p8, 1, 0 }
  0x72   : > { %s4777_s4 = scalar_select %p3728_p6, 1, 0 }
  0x73   : > { %p3076_p9 = scmp.lt.s32.totalorder %s3479_s21, 2  ;;  %s511_s29 = sand.u32 1, %s3475_s20  }
  0x74   : > { %p3734_p11 = por %p379_p10, %p55_p13  ;;  %s2685_s6 = sshll.u32 %s511_s29, 4 }
  0x75   : > { %s2736_s15 = sshll.u32 %s3479_s21, 8  ;;  %s515_s26 = scalar_lea.vmem [#allocation2], %s2685_s6 }
  0x76   : > { %s4778_s27 = scalar_select %p3734_p11, 1, 0 }
  0x77   : > { %s3742_s22 = scalar_lea.hbm %s4717_s0, %s2736_s15  ;;  %s522_s7 = sshll.u32 %s515_s26, 4  ;;  %s3748_s7 = int_to_ptr.vmem [resolvable:$true] %s522_s7 }
  0x78   : > { %p3744_p7 = pnand %p3076_p9, %p51_p5  ;;  %s3750_s8 = scalar_lea.sflag [#allocation3], %s511_s29 }
  0x79   : > { %s3371_s9 = scalar_lea.hbm %s3742_s22, 256  ;;  %s3376_s6 = scalar_lea.hbm %s4717_s0, 512 }
  0x7a   : > { %p3372_p12 = scmp.ne.s32.totalorder %s3742_s22, %s3371_s9  ;;  %p3373_p0 = pneg %p3744_p7 }
  0x7b   : > { %p3377_p5 = scmp.lt.s32.totalorder %s3742_s22, %s4717_s0  ;;  %p3378_p10 = scmp.lt.s32.totalorder %s3376_s6, %s3371_s9 }
  0x7c   : > { %p3374_p13 = pnand %p3373_p0, %p3372_p12 }
  0x7d   : > { %p3379_p9 = por %p3378_p10, %p3377_p5 }
  0x7e   : > { %p3375_p2 = pneg %p3374_p13 }
  0x80   : > { %p3380_p4 = pnand %p3379_p9, %p3375_p2 }
  0x82   : > { %3383 = shalt.err (!%p3380_p4)
}
  0x83   : > { %s3384_s29 = scalar_lea.vmem %s3748_s7, 256  ;;  %s3490_s12 = smov [#allocation2]  }
  0x84   : > { %p3385_p1 = scmp.ne.s32.totalorder %s3748_s7, %s3384_s29  ;;  %s3389_s14 = sshll.u32 %s3490_s12, 4  ;;  %s3390_s14 = int_to_ptr.vmem [resolvable:$false] %s3389_s14 }
  0x85   : > { %s3391_s15 = scalar_lea.vmem %s3390_s14, 512  ;;  %p3392_p13 = scmp.lt.s32.totalorder %s3748_s7, %s3390_s14 }
  0x86   : > { %p3387_p11 = pnand %p3385_p1, %p3373_p0  ;;  %p3393_p6 = scmp.lt.s32.totalorder %s3391_s15, %s3384_s29 }
  0x88   : > { %p3388_p12 = pneg %p3387_p11  ;;  %p3394_p8 = por %p3393_p6, %p3392_p13 }
  0x8a   : > { %p3395_p3 = pnand %p3394_p8, %p3388_p12 }
  0x8c   : > { %3398 = shalt.err (!%p3395_p3)
}
  0x8d   : > { %s4780_s9 = smov 8   ;;  %s4781_s17 = smov 128  }
  0x8e   : > { %3064 = dma.hbm_to_vmem [thread:$0]  (!%p3744_p7), %s3742_s22, 256, %s3748_s7, %s3750_s8, %s4781_s17, %s4781_s17, %s4780_s9  }
  0x8f   : > { %p4782_p1 = scmp.ne.s32.totalorder %s4766_s25, 0 }
  0x91   : > { %534 = sbr.rel (%p4782_p1) target bundleno = 5353 (0x14e9), region = 80 }
  0x96   : > { %s3777_s12 = sand.u32 1, %s3471_s19   ;;  %p4783_p3 = scmp.ne.s32.totalorder %s4776_s5, 0 }
  0x97   : > { %s2689_s14 = sshll.u32 %s3777_s12, 4  ;;  %s537_s6 = scalar_lea.sflag [#allocation3], %s3777_s12 }
  0x98   : > { %s3781_s26 = scalar_lea.vmem [#allocation2], %s2689_s14 }
  0x99   : > { %3442 = dma.done.wait (%p4783_p3), %s537_s6, 256  }
  0x9a   : > { %3444 = vsyncadd (%p4783_p3), %s537_s6, 4294967040  ;;  %p4784_p4 = scmp.eq.s32.totalorder %s3598_s24, 0 }
  0x9c   : > { %3446 = dma.done.wait (%p4784_p4), [#allocation6], 512   ;;  %p4785_p8 = pmov %p4784_p4 }
  0x9d   : > { %p4786_p6 = pmov %p4784_p4 }
  0x9e   : > { %3448 = vsyncadd (%p4785_p8), [#allocation6], 4294966784 }
  0x9f   : > { %3450 = dma.done.wait (%p4786_p6), [#allocation9], 512   ;;  %p4787_p11 = pmov %p4784_p4 }
  0xa0   : > { %p4788_p7 = pmov %p4784_p4 }
  0xa1   : > { %3452 = vsyncadd (%p4787_p11), [#allocation9], 4294966784 }
  0xa2   : > { %3454 = dma.done.wait (%p4788_p7), [#allocation12], 512   ;;  %p4789_p0 = pmov %p4784_p4 }
  0xa4   : > { %3456 = vsyncadd (%p4789_p0), [#allocation12], 4294966784  ;;  %p4790_p2 = pmov %p4789_p0 }
  0xa5   : > { %p4791_p5 = pmov %p4789_p0 }
  0xa6   : > { %3458 = dma.done.wait (%p4790_p2), [#allocation15], 256  }
  0xa7   : > { %3460 = vsyncadd (%p4791_p5), [#allocation15], 4294967040  ;;  %v4741_v0 = vmov 0.0   ;;  %v632_v1 = vld [vmem:[%s4718_s1 + $0x68] sm:$0xff]  ;;  %v631_v2 = vld [vmem:[%s4718_s1 + $0x60] sm:$0xff]  ;;  %vm635_vm0 = vcmask 261120  }
  0xa8   : > { %706 = vmatprep.mubr.f32.mxu1 %v4741_v0  ;;  %v628_v3 = vld [vmem:[%s4718_s1 + $0x48] sm:$0xff]  ;;  %666 = vmatprep.subr.mxu1 %v632_v1  ;;  %v627_v4 = vld [vmem:[%s4718_s1 + $0x40] sm:$0xff]  ;;  %v634_v10 = vld [vmem:[%s4718_s1 + $0x78] sm:$0xff]  ;;  %vm800_vm1 = vcmask 130048   ;;  %s3492_s7 = smov 48   ;;  %s3493_s22 = smov 80  }
  0xa9   : > { %667 = vmatpush1.msra.mxu1 %v631_v2  ;;  %v624_v5 = vld [vmem:[%s4718_s1 + $0x28] sm:$0xff]  ;;  %v623_v6 = vld [vmem:[%s4718_s1 + $0x20] sm:$0xff]  ;;  %v633_v11 = vld [vmem:[%s4718_s1 + $0x70] sm:$0xff]  ;;  %s3494_s5 = smov 32   ;;  %vm1394_vm10 = vcmask 392448   ;;  %s3495_s28 = smov 96  }
  0xaa   : > { %668 = vmatprep.subr.mxu1 %v628_v3  ;;  %v620_v7 = vld [vmem:[%s4718_s1 + $0x8] sm:$0xff]  ;;  %v619_v8 = vld [vmem:[%s4718_s1] sm:$0xff]  ;;  %v630_v12 = vld [vmem:[%s4718_s1 + $0x58] sm:$0xff]  ;;  %s4813_s23 = sld [smem:[#allocation35_spill]]  ;;  %p4819_p9 = scmp.ne.s32.totalorder %s4777_s4, 0 }
  0xab   : > { %669 = vmatpush1.msra.mxu1 %v627_v4  ;;  %v617_v9 = vld [vmem:[%s3781_s26] sm:$0xff]  ;;  %v618_v14 = vld [vmem:[%s3781_s26 + $0x8] sm:$0xff]  ;;  %s4818_s14 = sld [smem:[#allocation43_spill]]  ;;  %s3496_s25 = smov [#allocation16]  }
  0xac   : > { %670 = vmatprep.subr.mxu1 %v624_v5  ;;  %v629_v13 = vld [vmem:[%s4718_s1 + $0x50] sm:$0xff]  ;;  %v626_v15 = vld [vmem:[%s4718_s1 + $0x38] sm:$0xff]  ;;  %v3861_v19 = vld [vmem:[#allocation14] sm:$0xff]  ;;  %s3403_s26 = sshll.u32 %s3496_s25, 4  ;;  %s3404_s26 = int_to_ptr.vmem [resolvable:$false] %s3403_s26 }
  0xad   : > { %671 = vmatpush1.msra.mxu1 %v623_v6  ;;  %v625_v16 = vld [vmem:[%s4718_s1 + $0x30] sm:$0xff]  ;;  %v622_v17 = vld [vmem:[%s4718_s1 + $0x18] sm:$0xff]  ;;  %2885 = vmatprep.mubr.msk.f32.mxu0 %vm800_vm1, %v3861_v19  ;;  %v3877_v27 = vld [vmem:[#allocation11 + $0x8] sm:$0xff] }
  0xae   : > { %672 = vmatprep.subr.mxu1 %v620_v7  ;;  %v621_v18 = vld [vmem:[%s4718_s1 + $0x10] sm:$0xff]  ;;  %v3879_v28 = vld [vmem:[#allocation11] sm:$0xff]  ;;  %v3885_v31 = vld [vmem:[%s4730_s13 + $0xf8] sm:$0xff] }
  0xaf   : > { %673 = vmatpush1.msra.mxu1 %v619_v8  ;;  %v3891_v33 = vld [vmem:[%s4730_s13 + $0xf0] sm:$0xff]  ;;  %v3893_v34 = vld [vmem:[#allocation14 + $0x8] sm:$0xff]  ;;  %v3905_v37 = vld [vmem:[%s4730_s13 + $0xe0] sm:$0xff] }
  0xb0   : > { %2697 = vmatmul.mubr.msk.f32.vlgmr.msra.gmra.mxu1 %vm635_vm0, %v617_v9  ;;  %743 = vmatprep.subr.mxu1 %v634_v10  ;;  %v3898_v35 = vld [vmem:[%s4730_s13 + $0xe8] sm:$0xff]  ;;  %v3912_v39 = vld [vmem:[%s4730_s13 + $0xd8] sm:$0xff]  ;;  %v3921_v41 = vld [vmem:[%s4730_s13 + $0xd0] sm:$0xff] }
  0xb1   : > { %744 = vmatpush1.msra.mxu1 %v633_v11  ;;  %712 = vmatprep.mubr.f32.mxu1 %v4741_v0  ;;  %v3928_v43 = vld [vmem:[%s4730_s13 + $0xc8] sm:$0xff]  ;;  %v3936_v45 = vld [vmem:[%s4730_s13 + $0xc0] sm:$0xff]  ;;  %v3943_v47 = vld [vmem:[%s4730_s13 + $0xb8] sm:$0xff] }
  0xb2   : > { %745 = vmatprep.subr.mxu1 %v630_v12  ;;  %v3950_v49 = vld [vmem:[%s4730_s13 + $0xb0] sm:$0xff]  ;;  %v3957_v51 = vld [vmem:[%s4730_s13 + $0xa8] sm:$0xff]  ;;  %v3964_v53 = vld [vmem:[%s4730_s13 + $0xa0] sm:$0xff] }
  0xb3   : > { %746 = vmatpush1.msra.mxu1 %v629_v13  ;;  %v3971_v55 = vld [vmem:[%s4730_s13 + $0x98] sm:$0xff]  ;;  %v3978_v57 = vld [vmem:[%s4730_s13 + $0x90] sm:$0xff]  ;;  %v3985_v59 = vld [vmem:[%s4730_s13 + $0x88] sm:$0xff] }
  0xb4   : > { %2698 = vmatmul.mubr.msk.f32.gmra.mxu1 %vm635_vm0, %v618_v14  ;;  %747 = vmatprep.subr.mxu1 %v626_v15  ;;  %v3992_v61 = vld [vmem:[%s4730_s13 + $0x80] sm:$0xff]  ;;  %v3999_v63 = vld [vmem:[%s4730_s13 + $0x78] sm:$0xff]  ;;  %v4006_v2 = vld [vmem:[%s4730_s13 + $0x70] sm:$0xff] }
  0xb5   : > { %748 = vmatpush1.msra.mxu1 %v625_v16  ;;  %783 = vmatprep.mubr.f32.mxu1 %v4741_v0  ;;  %v4013_v4 = vld [vmem:[%s4730_s13 + $0x68] sm:$0xff]  ;;  %v4020_v6 = vld [vmem:[%s4730_s13 + $0x60] sm:$0xff]  ;;  %v4027_v8 = vld [vmem:[%s4730_s13 + $0x58] sm:$0xff] }
  0xb6   : > { %749 = vmatprep.subr.mxu1 %v622_v17  ;;  %v4034_v10 = vld [vmem:[%s4730_s13 + $0x50] sm:$0xff]  ;;  %v4041_v12 = vld [vmem:[%s4730_s13 + $0x48] sm:$0xff]  ;;  %v4055_v16 = vld [vmem:[%s4730_s13 + $0x38] sm:$0xff] }
  0xb7   : > { %750 = vmatpush1.msra.mxu1 %v621_v18  ;;  %4792 = vst [vmem:[#allocation23_spill] sm:$0xff] %v4055_v16  ;;  %v4062_v18 = vld [vmem:[%s4730_s13 + $0x30] sm:$0xff] }
  0xb8   : > { %2699 = vmatmul.mubr.msk.f32.vlgmr.msra.gmra.mxu1 %vm635_vm0, %v617_v9  ;;  %4793 = vst [vmem:[#allocation24_spill] sm:$0xff] %v4062_v18 }
  0xb9   : > { %789 = vmatprep.mubr.f32.mxu1 %v4741_v0 }
  0xbc   : > { %2700 = vmatmul.mubr.msk.f32.gmra.mxu1 %vm635_vm0, %v618_v14  ;;  %v4048_v14 = vld [vmem:[%s4730_s13 + $0x40] sm:$0xff] }
 0x170   : > { %v3865_v20 = vpop.f32.mrf.mxu1 }
 0x171   : > { %v1059_v42 = vmul.f32 %v3905_v37, %v3865_v20  ;;  %v1055_v50 = vmul.f32 %v3936_v45, %v3865_v20  ;;  %v1051_v58 = vmul.f32 %v3964_v53, %v3865_v20  ;;  %v1047_v3 = vmul.f32 %v3992_v61, %v3865_v20 }
 0x172   : > { %v3867_v21 = vpop.f32.mrf.mxu1  ;;  %v1043_v11 = vmul.f32 %v4020_v6, %v3865_v20 }
 0x173   : > { %v1060_v40 = vmul.f32 %v3898_v35, %v3867_v21  ;;  %v1056_v48 = vmul.f32 %v3928_v43, %v3867_v21  ;;  %v1052_v56 = vmul.f32 %v3957_v51, %v3867_v21  ;;  %v1048_v1 = vmul.f32 %v3985_v59, %v3867_v21 }
 0x174   : > { %v3869_v22 = vpop.f32.mrf.mxu1  ;;  %v1044_v9 = vmul.f32 %v4013_v4, %v3867_v21  ;;  %v1040_v17 = vmul.f32 %v4041_v12, %v3867_v21 }
 0x175   : > { %v1061_v38 = vmul.f32 %v3891_v33, %v3869_v22  ;;  %v1057_v46 = vmul.f32 %v3921_v41, %v3869_v22  ;;  %v1053_v54 = vmul.f32 %v3950_v49, %v3869_v22  ;;  %v1049_v62 = vmul.f32 %v3978_v57, %v3869_v22 }
 0x176   : > { %v3871_v23 = vpop.f32.mrf.mxu1  ;;  %v1045_v7 = vmul.f32 %v4006_v2, %v3869_v22  ;;  %v1041_v15 = vmul.f32 %v4034_v10, %v3869_v22 }
 0x177   : > { %v1062_v36 = vmul.f32 %v3885_v31, %v3871_v23  ;;  %v1058_v44 = vmul.f32 %v3912_v39, %v3871_v23  ;;  %v1054_v52 = vmul.f32 %v3943_v47, %v3871_v23  ;;  %v1050_v60 = vmul.f32 %v3971_v55, %v3871_v23 }
 0x178   : > { %v3873_v24 = vpop.f32.mrf.mxu1  ;;  %v1046_v5 = vmul.f32 %v3999_v63, %v3871_v23  ;;  %v1042_v13 = vmul.f32 %v4027_v8, %v3871_v23 }
 0x17a   : > { %v787_v25 = vpop.f32.mrf.mxu1 }
 0x17b   : > { %v798_v32 = vmul.f32 %v3879_v28, %v787_v25  ;;  %v1039_v25 = vmul.f32 %v4048_v14, %v3865_v20 }
 0x17c   : > { %v3875_v26 = vpop.f32.mrf.mxu1 }
 0x17e   : > { %v793_v29 = vpop.f32.mrf.mxu1 }
 0x17f   : > { %v799_v30 = vmul.f32 %v3877_v27, %v793_v29  ;;  %v4069_v29 = vld [vmem:[%s4730_s13 + $0x28] sm:$0xff] }
 0x180   : > { %4794 = vst [vmem:[#allocation25_spill] sm:$0xff] %v4069_v29 }
 0x181   : > { %2881 = vmatprep.subr.mxu0 %v799_v30 }
 0x182   : > { %2882 = vmatpush3.msra.mxu0 %v799_v30  ;;  %v1038_v30 = vmul.f32 %v4055_v16, %v3871_v23 }
 0x183   : > { %2883 = vmatprep.subr.mxu0 %v798_v32 }
 0x184   : > { %2884 = vmatpush3.msra.mxu0 %v798_v32  ;;  %v4076_v32 = vld [vmem:[%s4730_s13 + $0x20] sm:$0xff] }
 0x185   : > { %2886 = vmatmul.mubr.msk.f32.vlgmr.msra.gmra.mxu0 %vm800_vm1, %v3893_v34  ;;  %1063 = vmatprep.subr.mxu0 %v1062_v36  ;;  %4795 = vst [vmem:[#allocation26_spill] sm:$0xff] %v4076_v32  ;;  %v1037_v36 = vmul.f32 %v4062_v18, %v3869_v22 }
 0x186   : > { %1064 = vmatpush1.msra.mxu0 %v1061_v38  ;;  %1127 = vmatprep.mubr.f32.mxu0 %v4741_v0  ;;  %v4083_v38 = vld [vmem:[%s4730_s13 + $0x18] sm:$0xff] }
 0x187   : > { %1065 = vmatprep.subr.mxu0 %v1060_v40  ;;  %4796 = vst [vmem:[#allocation27_spill] sm:$0xff] %v4083_v38  ;;  %v1036_v40 = vmul.f32 %v4069_v29, %v3867_v21  ;;  %v1179_v0 = vld [vmem:[%s4719_s2 + $0x78] sm:$0xff] }
 0x188   : > { %1066 = vmatpush1.msra.mxu0 %v1059_v42  ;;  %v4090_v42 = vld [vmem:[%s4730_s13 + $0x10] sm:$0xff] }
 0x189   : > { %1067 = vmatprep.subr.mxu0 %v1058_v44  ;;  %4797 = vst [vmem:[#allocation28_spill] sm:$0xff] %v4090_v42  ;;  %v1035_v44 = vmul.f32 %v4076_v32, %v3865_v20 }
 0x18a   : > { %1068 = vmatpush1.msra.mxu0 %v1057_v46  ;;  %v4097_v46 = vld [vmem:[%s4730_s13 + $0x8] sm:$0xff] }
 0x18b   : > { %1069 = vmatprep.subr.mxu0 %v1056_v48  ;;  %4798 = vst [vmem:[#allocation29_spill] sm:$0xff] %v4097_v46  ;;  %v1034_v48 = vmul.f32 %v4083_v38, %v3871_v23  ;;  %v4115_v23 = vld [vmem:[%s4728_s11 + $0x78] sm:$0xff] }
 0x18c   : > { %1070 = vmatpush1.msra.mxu0 %v1055_v50  ;;  %v4104_v50 = vld [vmem:[%s4730_s13] sm:$0xff]  ;;  %2888 = vmatprep.subr.mxu1 %v4115_v23 }
 0x18d   : > { %1071 = vmatprep.subr.mxu0 %v1054_v52  ;;  %4799 = vst [vmem:[#allocation30_spill] sm:$0xff] %v4104_v50  ;;  %v1033_v52 = vmul.f32 %v4090_v42, %v3869_v22  ;;  %2889 = vmatpush3.msra.mxu1 %v4115_v23  ;;  %v4141_v22 = vld [vmem:[%s4728_s11 + $0x58] sm:$0xff] }
 0x18e   : > { %1072 = vmatpush1.msra.mxu0 %v1053_v54  ;;  %v1032_v54 = vmul.f32 %v4097_v46, %v3867_v21  ;;  %v4134_v21 = vld [vmem:[%s4728_s11 + $0x60] sm:$0xff] }
 0x18f   : > { %1073 = vmatprep.subr.mxu0 %v1052_v56  ;;  %v1031_v56 = vmul.f32 %v4104_v50, %v3865_v20  ;;  %v4127_v20 = vld [vmem:[%s4728_s11 + $0x68] sm:$0xff] }
 0x190   : > { %1074 = vmatpush1.msra.mxu0 %v1051_v58  ;;  %v4120_v58 = vld [vmem:[%s4728_s11 + $0x70] sm:$0xff] }
 0x191   : > { %1075 = vmatprep.subr.mxu0 %v1050_v60  ;;  %2890 = vmatprep.subr.mxu1 %v4120_v58 }
 0x192   : > { %1076 = vmatpush1.msra.mxu0 %v1049_v62  ;;  %2891 = vmatpush3.msra.mxu1 %v4120_v58 }
 0x193   : > { %1077 = vmatprep.subr.mxu0 %v1048_v1  ;;  %2892 = vmatprep.subr.mxu1 %v4127_v20 }
 0x194   : > { %1078 = vmatpush1.msra.mxu0 %v1047_v3  ;;  %2893 = vmatpush3.msra.mxu1 %v4127_v20 }
 0x195   : > { %1079 = vmatprep.subr.mxu0 %v1046_v5  ;;  %2894 = vmatprep.subr.mxu1 %v4134_v21 }
 0x196   : > { %1080 = vmatpush1.msra.mxu0 %v1045_v7  ;;  %2895 = vmatpush3.msra.mxu1 %v4134_v21 }
 0x197   : > { %1081 = vmatprep.subr.mxu0 %v1044_v9  ;;  %2896 = vmatprep.subr.mxu1 %v4141_v22  ;;  %v890_v9 = vld [vmem:[#allocation5] sm:$0xff] }
 0x198   : > { %1082 = vmatpush1.msra.mxu0 %v1043_v11  ;;  %2897 = vmatpush3.msra.mxu1 %v4141_v22 }
 0x199   : > { %1083 = vmatprep.subr.mxu0 %v1042_v13 }
 0x19a   : > { %1084 = vmatpush1.msra.mxu0 %v1041_v15 }
 0x19b   : > { %1085 = vmatprep.subr.mxu0 %v1040_v17  ;;  %v891_v17 = vld [vmem:[#allocation5 + $0x8] sm:$0xff] }
 0x19c   : > { %1086 = vmatpush1.msra.mxu0 %v1039_v25 }
 0x19d   : > { %1087 = vmatprep.subr.mxu0 %v1038_v30  ;;  %v4152_v30 = vld [vmem:[%s4728_s11 + $0x50] sm:$0xff] }
 0x19e   : > { %1088 = vmatpush1.msra.mxu0 %v1037_v36  ;;  %2898 = vmatprep.subr.mxu1 %v4152_v30  ;;  %v4173_v36 = vld [vmem:[%s4728_s11 + $0x38] sm:$0xff] }
 0x19f   : > { %1089 = vmatprep.subr.mxu0 %v1036_v40  ;;  %2899 = vmatpush3.msra.mxu1 %v4152_v30  ;;  %v4180_v40 = vld [vmem:[%s4728_s11 + $0x30] sm:$0xff] }
 0x1a0   : > { %1090 = vmatpush1.msra.mxu0 %v1035_v44  ;;  %v4185_v44 = vld [vmem:[%s4728_s11 + $0x28] sm:$0xff] }
 0x1a1   : > { %1091 = vmatprep.subr.mxu0 %v1034_v48  ;;  %v4192_v48 = vld [vmem:[%s4728_s11 + $0x20] sm:$0xff] }
 0x1a2   : > { %1092 = vmatpush1.msra.mxu0 %v1033_v52  ;;  %v4199_v52 = vld [vmem:[%s4728_s11 + $0x18] sm:$0xff] }
 0x1a3   : > { %1093 = vmatprep.subr.mxu0 %v1032_v54  ;;  %v4206_v54 = vld [vmem:[%s4728_s11 + $0x10] sm:$0xff] }
 0x1a4   : > { %1094 = vmatpush1.msra.mxu0 %v1031_v56  ;;  %v4213_v56 = vld [vmem:[%s4728_s11 + $0x8] sm:$0xff] }
 0x245   : > { %v2887_v60 = vpop.f32.mrf.mxu0 }
 0x246   : > { %v883_v62 = vadd.f32 %v2887_v60, %v3875_v26  ;;  %v4166_v26 = vld [vmem:[%s4728_s11 + $0x40] sm:$0xff] }
 0x247   : > { %v873_v1 = vpop.f32.mrf.mxu0  ;;  %v4220_v60 = vld [vmem:[%s4728_s11] sm:$0xff] }
 0x248   : > { %v882_v3 = vadd.f32 %v873_v1, %v3873_v24  ;;  %v887_v5 = vmul.f32 0.2, %v883_v62  ;;  %vm885_vm3 = vcmp.gt.f32.partialorder %v883_v62, 0.0  ;;  %v4159_v24 = vld [vmem:[%s4728_s11 + $0x48] sm:$0xff] }
 0x249   : > { %2900 = vmatprep.subr.mxu1 %v4159_v24 }
 0x24a   : > { %v886_v7 = vmul.f32 0.2, %v882_v3  ;;  %vm884_vm2 = vcmp.gt.f32.partialorder %v882_v3, 0.0  ;;  %v889_v15 = vsel %vm885_vm3, %v883_v62, %v887_v5  ;;  %2901 = vmatpush3.msra.mxu1 %v4159_v24 }
 0x24b   : > { %v893_v25 = vadd.f32 %v891_v17, %v889_v15  ;;  %2902 = vmatprep.subr.mxu1 %v4166_v26  ;;  %v1195_v17 = vld [vmem:[%s4719_s2 + $0xf8] sm:$0xff] }
 0x24c   : > { %v888_v11 = vsel %vm884_vm2, %v882_v3, %v886_v7  ;;  %2903 = vmatpush3.msra.mxu1 %v4166_v26 }
 0x24d   : > { %v892_v13 = vadd.f32 %v890_v9, %v888_v11  ;;  %2904 = vmatprep.subr.mxu1 %v4173_v36 }
 0x24e   : > { %2905 = vmatpush3.msra.mxu1 %v4173_v36 }
 0x24f   : > { %894 = vmax.xlane.f32.xlu0 %v892_v13  ;;  %2906 = vmatprep.subr.mxu1 %v4180_v40 }
 0x250   : > { %2907 = vmatpush3.msra.mxu1 %v4180_v40 }
 0x251   : > { %2908 = vmatprep.subr.mxu1 %v4185_v44 }
 0x252   : > { %2909 = vmatpush3.msra.mxu1 %v4185_v44 }
 0x253   : > { %896 = vmax.xlane.f32.xlu0 %v893_v25  ;;  %2910 = vmatprep.subr.mxu1 %v4192_v48 }
 0x254   : > { %2911 = vmatpush3.msra.mxu1 %v4192_v48 }
 0x255   : > { %2912 = vmatprep.subr.mxu1 %v4199_v52 }
 0x256   : > { %2913 = vmatpush3.msra.mxu1 %v4199_v52 }
 0x257   : > { %2914 = vmatprep.subr.mxu1 %v4206_v54 }
 0x258   : > { %2915 = vmatpush3.msra.mxu1 %v4206_v54 }
 0x259   : > { %2916 = vmatprep.subr.mxu1 %v4213_v56 }
 0x25a   : > { %2917 = vmatpush3.msra.mxu1 %v4213_v56 }
 0x25b   : > { %2918 = vmatprep.subr.mxu1 %v4220_v60 }
 0x25c   : > { %2919 = vmatpush3.msra.mxu1 %v4220_v60 }
 0x25d   : > { %2759 = vmatprep.subr.mxu1 %v1195_v17 }
 0x2d8   : > { %v895_v62 = vpop.xlane.xlu0 %894 }
 0x2d9   : > { %v898_v1 = vsub.f32 %v892_v13, %v895_v62  ;;  %v1194_v13 = vld [vmem:[%s4719_s2 + $0xf0] sm:$0xff]  ;;  %v1193_v62 = vld [vmem:[%s4719_s2 + $0xe8] sm:$0xff] }
 0x2db   : > { %v900_v3 = vmul.f32 1.442695, %v898_v1  ;;  %v1177_v1 = vld [vmem:[%s4719_s2 + $0x68] sm:$0xff] }
 0x2dc   : > { %v897_v5 = vpop.xlane.xlu0 %896 }
 0x2dd   : > { %3131 = vpow2.f32 %v900_v3  ;;  %v899_v7 = vsub.f32 %v893_v25, %v897_v5  ;;  %v1178_v25 = vld [vmem:[%s4719_s2 + $0x70] sm:$0xff]  ;;  %v1192_v3 = vld [vmem:[%s4719_s2 + $0xe0] sm:$0xff] }
 0x2df   : > { %v902_v9 = vmul.f32 1.442695, %v899_v7 }
 0x2e1   : > { %3133 = vpow2.f32 %v902_v9 }
 0x2ea   : > { %v3132_v11 = vpop.eup %3131 }
 0x2eb   : > { %2920 = vmatprep.mubr.f32.mxu1 %v3132_v11 }
 0x2ee   : > { %v3134_v15 = vpop.eup %3133 }
 0x2ef   : > { %2921 = vmatmul.mubr.f32.vlgmr.msra.gmra.mxu1 %v3134_v15 }
 0x2f0   : > { %2760 = vmatpush3.msra.mxu1 %v1179_v0 }
 0x2f1   : > { %2761 = vmatprep.subr.mxu1 %v1194_v13  ;;  %v4800_v13 = vmov 0.0  }
 0x2f2   : > { %2762 = vmatpush3.msra.mxu1 %v1178_v25  ;;  %v1176_v25 = vld [vmem:[%s4719_s2 + $0x60] sm:$0xff] }
 0x2f3   : > { %2763 = vmatprep.subr.mxu1 %v1193_v62  ;;  %v1191_v62 = vld [vmem:[%s4719_s2 + $0xd8] sm:$0xff] }
 0x2f4   : > { %2764 = vmatpush3.msra.mxu1 %v1177_v1  ;;  %v1189_v1 = vld [vmem:[%s4719_s2 + $0xc8] sm:$0xff] }
 0x2f5   : > { %2765 = vmatprep.subr.mxu1 %v1192_v3  ;;  %v1173_v3 = vld [vmem:[%s4719_s2 + $0x48] sm:$0xff] }
 0x2f6   : > { %2766 = vmatpush3.msra.mxu1 %v1176_v25  ;;  %v1170_v25 = vld [vmem:[%s4719_s2 + $0x30] sm:$0xff] }
 0x2f7   : > { %2767 = vmatprep.subr.mxu1 %v1191_v62  ;;  %v1185_v62 = vld [vmem:[%s4719_s2 + $0xa8] sm:$0xff] }
 0x3af   : > { %v2922_v5 = vpop.f32.mrf.mxu1 }
 0x3b1   : > { %v986_v7 = vpop.f32.mrf.mxu1 }
 0x3b2   : > { %3135 = vrcp.f32 %v986_v7  ;;  %v1172_v7 = vld [vmem:[%s4719_s2 + $0x40] sm:$0xff] }
 0x3b3   : > { %3137 = vrcp.f32 %v2922_v5  ;;  %v1188_v5 = vld [vmem:[%s4719_s2 + $0xc0] sm:$0xff] }
 0x3bf   : > { %v3136_v0 = vpop.eup %3135 }
 0x3c0   : > { %v996_v9 = vmul.f32 %v3136_v0, %v3132_v11  ;;  %v3138_v17 = vpop.eup %3137  ;;  %v1175_v11 = vld [vmem:[%s4719_s2 + $0x58] sm:$0xff] }
 0x3c1   : > { %v998_v50 = vmul.f32 %v3138_v17, %v3134_v15  ;;  %2768 = vmatpush3.msra.mxu1 %v1175_v11  ;;  %v1174_v15 = vld [vmem:[%s4719_s2 + $0x50] sm:$0xff]  ;;  %v1187_v0 = vld [vmem:[%s4719_s2 + $0xb8] sm:$0xff]  ;;  %v1169_v11 = vld [vmem:[%s4719_s2 + $0x28] sm:$0xff] }
 0x3c2   : > { %1128 = vmatmul.mubr.f32.vlgmr.msra.gmra.mxu0 %v996_v9  ;;  %v1171_v9 = vld [vmem:[%s4719_s2 + $0x38] sm:$0xff]  ;;  %v1186_v17 = vld [vmem:[%s4719_s2 + $0xb0] sm:$0xff] }
 0x3c3   : > { %1133 = vmatprep.mubr.f32.mxu0 %v4800_v13 }
 0x3c6   : > { %1134 = vmatmul.mubr.f32.gmra.mxu0 %v998_v50  ;;  %v1190_v50 = vld [vmem:[%s4719_s2 + $0xd0] sm:$0xff] }
 0x3c7   : > { %2927 = vmatprep.mubr.msk.f32.mxu0 %vm800_vm1, %v3861_v19  ;;  %2769 = vmatprep.subr.mxu1 %v1190_v50  ;;  %v1184_v50 = vld [vmem:[%s4719_s2 + $0xa0] sm:$0xff] }
 0x3c8   : > { %2770 = vmatpush3.msra.mxu1 %v1174_v15  ;;  %v1168_v15 = vld [vmem:[%s4719_s2 + $0x20] sm:$0xff] }
 0x3c9   : > { %2771 = vmatprep.subr.mxu1 %v1189_v1  ;;  %v1183_v1 = vld [vmem:[%s4719_s2 + $0x98] sm:$0xff] }
 0x3ca   : > { %2772 = vmatpush3.msra.mxu1 %v1173_v3  ;;  %v1167_v3 = vld [vmem:[%s4719_s2 + $0x18] sm:$0xff] }
 0x3cb   : > { %2773 = vmatprep.subr.mxu1 %v1188_v5  ;;  %v1182_v5 = vld [vmem:[%s4719_s2 + $0x90] sm:$0xff] }
 0x3cc   : > { %2774 = vmatpush3.msra.mxu1 %v1172_v7  ;;  %v1166_v7 = vld [vmem:[%s4719_s2 + $0x10] sm:$0xff] }
 0x3cd   : > { %2775 = vmatprep.subr.mxu1 %v1187_v0  ;;  %v1181_v0 = vld [vmem:[%s4719_s2 + $0x88] sm:$0xff] }
 0x3ce   : > { %2776 = vmatpush3.msra.mxu1 %v1171_v9  ;;  %v1165_v9 = vld [vmem:[%s4719_s2 + $0x8] sm:$0xff] }
 0x3cf   : > { %2777 = vmatprep.subr.mxu1 %v1186_v17  ;;  %v1180_v17 = vld [vmem:[%s4719_s2 + $0x80] sm:$0xff] }
 0x3d0   : > { %2778 = vmatpush3.msra.mxu1 %v1170_v25  ;;  %v1164_v25 = vld [vmem:[%s4719_s2] sm:$0xff] }
 0x3d1   : > { %2779 = vmatprep.subr.mxu1 %v1185_v62  ;;  %v1272_v62 = vld [vmem:[%s4727_s10 + $0x8] sm:$0xff] }
 0x3d2   : > { %2780 = vmatpush3.msra.mxu1 %v1169_v11  ;;  %1277 = vrot.lane.b32.xlu1 %v1272_v62, %s3492_s7  ;;  %v1271_v11 = vld [vmem:[%s4727_s10] sm:$0xff] }
 0x3d3   : > { %2781 = vmatprep.subr.mxu1 %v1184_v50 }
 0x3d4   : > { %2782 = vmatpush3.msra.mxu1 %v1168_v15 }
 0x3d5   : > { %2783 = vmatprep.subr.mxu1 %v1183_v1 }
 0x3d6   : > { %2784 = vmatpush3.msra.mxu1 %v1167_v3  ;;  %1275 = vrot.lane.b32.xlu1 %v1271_v11, %s3492_s7  ;;  %s2530_s7 = scalar_lea.sflag [#allocation4], %s3777_s12 }
 0x3d7   : > { %2785 = vmatprep.subr.mxu1 %v1182_v5 }
 0x3d8   : > { %2786 = vmatpush3.msra.mxu1 %v1166_v7 }
 0x3d9   : > { %2787 = vmatprep.subr.mxu1 %v1181_v0 }
 0x3da   : > { %2788 = vmatpush3.msra.mxu1 %v1165_v9 }
 0x3db   : > { %2789 = vmatprep.subr.mxu1 %v1180_v17 }
 0x3dc   : > { %2790 = vmatpush3.msra.mxu1 %v1164_v25 }
 0x482   : > { %v1129_v50 = vpop.f32.mrf.mxu0 }
 0x483   : > { %v1144_v15 = vmin.f32 %v1129_v50, 0.0  ;;  %vm1140_vm5 = vcmp.gt.f32.partialorder %v1129_v50, 0.0 }
 0x484   : > { %v1131_v1 = vpop.f32.mrf.mxu0 }
 0x485   : > { %v1148_v3 = vmul.f32 1.442695, %v1144_v15  ;;  %v1145_v5 = vmin.f32 %v1131_v1, 0.0  ;;  %vm1141_vm4 = vcmp.gt.f32.partialorder %v1131_v1, 0.0 }
 0x486   : > { %v1135_v7 = vpop.f32.mrf.mxu0 }
 0x487   : > { %3139 = vpow2.f32 %v1148_v3  ;;  %v1150_v0 = vmul.f32 1.442695, %v1145_v5  ;;  %v1146_v9 = vmin.f32 %v1135_v7, 0.0  ;;  %vm1142_vm7 = vcmp.gt.f32.partialorder %v1135_v7, 0.0 }
 0x488   : > { %v1137_v17 = vpop.f32.mrf.mxu0 }
 0x489   : > { %3141 = vpow2.f32 %v1150_v0  ;;  %v1152_v25 = vmul.f32 1.442695, %v1146_v9  ;;  %v1147_v46 = vmin.f32 %v1137_v17, 0.0  ;;  %vm1143_vm6 = vcmp.gt.f32.partialorder %v1137_v17, 0.0 }
 0x48b   : > { %3143 = vpow2.f32 %v1152_v25  ;;  %v1154_v62 = vmul.f32 1.442695, %v1147_v46 }
 0x48d   : > { %3145 = vpow2.f32 %v1154_v62  ;;  %v4349_v62 = vld [vmem:[#allocation13] sm:$0xff] }
 0x48e   : > { %4804 = vst [vmem:[#allocation34_spill] sm:$0xff] %v4349_v62 }
 0x494   : > { %v3140_v42 = vpop.eup %3139 }
 0x495   : > { %v2703_v32 = vadd.f32 -1.0, %v3140_v42 }
 0x496   : > { %v3142_v38 = vpop.eup %3141 }
 0x497   : > { %v2704_v11 = vadd.f32 -1.0, %v3142_v38  ;;  %v1160_v3 = vsel %vm1140_vm5, %v1129_v50, %v2703_v32  ;;  %v4333_v38 = vpop.permute.xlu1 %1277 }
 0x498   : > { %v3144_v29 = vpop.eup %3143  ;;  %4801 = vst [vmem:[#allocation31_spill] sm:$0xff] %v4333_v38 }
 0x499   : > { %v1161_v15 = vsel %vm1141_vm4, %v1131_v1, %v2704_v11  ;;  %v2705_v5 = vadd.f32 -1.0, %v3144_v29 }
 0x49a   : > { %v3146_v18 = vpop.eup %3145  ;;  %1260 = vmatprep.mubr.f32.mxu1 %v1161_v15 }
 0x49b   : > { %1261 = vmatmul.mubr.f32.vlgmr.msra.gmra.mxu1 %v1160_v3  ;;  %v2706_v16 = vadd.f32 -1.0, %v3146_v18  ;;  %v1162_v46 = vsel %vm1142_vm7, %v1135_v7, %v2705_v5  ;;  %v4335_v1 = vpop.permute.xlu1 %1275  ;;  %v1382_v3 = vld [vmem:[#allocation7] sm:$0xff]  ;;  %v1383_v5 = vld [vmem:[#allocation7 + $0x8] sm:$0xff] }
 0x49c   : > { %4802 = vst [vmem:[#allocation32_spill] sm:$0xff] %v4335_v1 }
 0x49d   : > { %v1163_v0 = vsel %vm1143_vm6, %v1137_v17, %v2706_v16  ;;  %v4347_v17 = vld [vmem:[#allocation13 + $0x8] sm:$0xff] }
 0x49e   : > { %1265 = vmatprep.mubr.f32.mxu1 %v1163_v0  ;;  %4803 = vst [vmem:[#allocation33_spill] sm:$0xff] %v4347_v17 }
 0x49f   : > { %1266 = vmatmul.mubr.f32.gmra.mxu1 %v1162_v46 }
 0x4a0   : > { %2948 = vmatprep.mubr.msk.f32.mxu1 %vm800_vm1, %v3861_v19 }
 0x55b   : > { %v2791_v42 = vpop.f32.mrf.mxu1 }
 0x55d   : > { %v2792_v9 = vpop.f32.mrf.mxu1 }
 0x55e   : > { %v4337_v25 = vadd.f32 %v2792_v9, %v2791_v42 }
 0x55f   : > { %v2794_v29 = vpop.f32.mrf.mxu1 }
 0x560   : > { %v1281_v18 = vmul.f32 %v4337_v25, %v4335_v1 }
 0x561   : > { %v2795_v32 = vpop.f32.mrf.mxu1 }
 0x562   : > { %v4341_v16 = vadd.f32 %v2795_v32, %v2794_v29  ;;  %1285 = vrot.lane.b32.xlu1 %v1281_v18, %s3493_s22 }
 0x564   : > { %v1282_v19 = vmul.f32 %v4341_v16, %v4333_v38 }
 0x566   : > { %1287 = vrot.lane.b32.xlu0 %v1282_v19, %s3493_s22 }
 0x5d4   : > { %v1286_v7 = vpop.permute.xlu1 %1285 }
 0x5d8   : > { %v1288_v50 = vpop.permute.xlu0 %1287 }
 0x5d9   : > { %2923 = vmatprep.subr.mxu0 %v1288_v50 }
 0x5da   : > { %2924 = vmatpush3.msra.mxu0 %v1288_v50 }
 0x5db   : > { %2925 = vmatprep.subr.mxu0 %v1286_v7 }
 0x5dc   : > { %2926 = vmatpush3.msra.mxu0 %v1286_v7 }
 0x5dd   : > { %2928 = vmatmul.mubr.msk.f32.vlgmr.msra.gmra.mxu0 %vm800_vm1, %v3893_v34  ;;  %2930 = vmatprep.subr.mxu0 %v4347_v17 }
 0x5de   : > { %2931 = vmatpush3.msra.mxu0 %v4347_v17 }
 0x5df   : > { %2932 = vmatprep.subr.mxu0 %v4349_v62 }
 0x5e0   : > { %2933 = vmatpush3.msra.mxu0 %v4349_v62 }
 0x5e1   : > { %2937 = vmatprep.subr.mxu0 %v4341_v16 }
 0x69d   : > { %v2929_v11 = vpop.f32.mrf.mxu0 }
 0x69e   : > { %1370 = vrot.lane.b32.xlu1 %v2929_v11, %s3494_s5 }
 0x69f   : > { %v1357_v15 = vpop.f32.mrf.mxu0 }
 0x6a2   : > { %1368 = vrot.lane.b32.xlu1 %v1357_v15, %s3494_s5 }
 0x6a6   : > { %1386 = vrot.lane.b32.xlu1 %v1382_v3, %s3494_s5 }
 0x6aa   : > { %1388 = vrot.lane.b32.xlu1 %v1383_v5, %s3494_s5 }
 0x710   : > { %v1371_v0 = vpop.permute.xlu1 %1370 }
 0x711   : > { %v1375_v46 = vadd.f32 %v4341_v16, %v1371_v0 }
 0x713   : > { %v1379_v18 = vmul.f32 0.2, %v1375_v46  ;;  %vm1377_vm9 = vcmp.gt.f32.partialorder %v1375_v46, 0.0 }
 0x714   : > { %v1369_v42 = vpop.permute.xlu1 %1368 }
 0x715   : > { %v1374_v9 = vadd.f32 %v4337_v25, %v1369_v42  ;;  %v1381_v7 = vsel %vm1377_vm9, %v1375_v46, %v1379_v18 }
 0x717   : > { %v1378_v29 = vmul.f32 0.2, %v1374_v9  ;;  %vm1376_vm8 = vcmp.gt.f32.partialorder %v1374_v9, 0.0 }
 0x718   : > { %v1387_v32 = vpop.permute.xlu1 %1386 }
 0x719   : > { %v1380_v19 = vsel %vm1376_vm8, %v1374_v9, %v1378_v29 }
 0x71a   : > { %v1392_v50 = vadd.f32 %v1387_v32, %v1380_v19 }
 0x71c   : > { %v1389_v11 = vpop.permute.xlu1 %1388  ;;  %v1395_v15 = vsel %vm1394_vm10, %v1392_v50, -inf }
 0x71d   : > { %v1393_v3 = vadd.f32 %v1389_v11, %v1381_v7  ;;  %1396 = vmax.xlane.f32.xlu1 %v1395_v15  ;;  %v1616_v11 = vld [vmem:[%s4720_s3 + $0x68] sm:$0xff]  ;;  %v1615_v15 = vld [vmem:[%s4720_s3 + $0x60] sm:$0xff] }
 0x71f   : > { %v1398_v5 = vsel %vm1394_vm10, %v1393_v3, -inf }
 0x720   : > { %1399 = vmax.xlane.f32.xlu0 %v1398_v5  ;;  %v1611_v5 = vld [vmem:[%s4720_s3 + $0x40] sm:$0xff] }
 0x7a6   : > { %v1397_v0 = vpop.xlane.xlu1 %1396 }
 0x7a7   : > { %v1401_v62 = vsub.f32 %v1392_v50, %v1397_v0  ;;  %v1608_v0 = vld [vmem:[%s4720_s3 + $0x28] sm:$0xff] }
 0x7a9   : > { %v1403_v42 = vmul.f32 1.442695, %v1401_v62  ;;  %v1400_v17 = vpop.xlane.xlu0 %1399 }
 0x7aa   : > { %v1402_v38 = vsub.f32 %v1393_v3, %v1400_v17  ;;  %v1612_v3 = vld [vmem:[%s4720_s3 + $0x48] sm:$0xff] }
 0x7ab   : > { %3147 = vpow2.f32 %v1403_v42  ;;  %v1607_v42 = vld [vmem:[%s4720_s3 + $0x20] sm:$0xff] }
 0x7ac   : > { %v1405_v1 = vmul.f32 1.442695, %v1402_v38 }
 0x7ae   : > { %3149 = vpow2.f32 %v1405_v1 }
 0x7b8   : > { %v3148_v9 = vpop.eup %3147 }
 0x7b9   : > { %1411 = vrot.lane.b32.xlu0 %v3148_v9, %s3495_s28 }
 0x7bb   : > { %v3150_v46 = vpop.eup %3149 }
 0x7bc   : > { %1413 = vrot.lane.b32.xlu1 %v3150_v46, %s3495_s28 }
 0x82b   : > { %v1412_v29 = vpop.permute.xlu0 %1411 }
 0x82c   : > { %2934 = vmatprep.mubr.msk.f32.mxu0 %vm800_vm1, %v1412_v29  ;;  %v1618_v29 = vld [vmem:[%s4720_s3 + $0x78] sm:$0xff] }
 0x82e   : > { %v1414_v18 = vpop.permute.xlu1 %1413 }
 0x82f   : > { %2935 = vmatmul.mubr.msk.f32.vlgmr.msra.gmra.mxu0 %vm800_vm1, %v1414_v18 }
 0x830   : > { %2938 = vmatpush3.msra.mxu0 %v4341_v16 }
 0x831   : > { %2939 = vmatprep.subr.mxu0 %v4337_v25 }
 0x832   : > { %2940 = vmatpush3.msra.mxu0 %v4337_v25 }
 0x833   : > { %1649 = vmatprep.subr.mxu0 %v1616_v11  ;;  %v1614_v11 = vld [vmem:[%s4720_s3 + $0x58] sm:$0xff] }
 0x8ef   : > { %v2936_v38 = vpop.f32.mrf.mxu0 }
 0x8f0   : > { %1498 = vrot.lane.b32.xlu0 %v2936_v38, %s3494_s5 }
 0x8f1   : > { %v1485_v1 = vpop.f32.mrf.mxu0 }
 0x8f2   : > { %1496 = vrot.lane.b32.xlu1 %v1485_v1, %s3494_s5 }
 0x962   : > { %v1499_v17 = vpop.permute.xlu0 %1498 }
 0x963   : > { %3151 = vrcp.f32 %v1499_v17 }
 0x964   : > { %v1497_v62 = vpop.permute.xlu1 %1496 }
 0x965   : > { %3153 = vrcp.f32 %v1497_v62 }
 0x970   : > { %v3152_v32 = vpop.eup %3151 }
 0x971   : > { %v1505_v19 = vmul.f32 %v3152_v32, %v3150_v46  ;;  %v1603_v46 = vld [vmem:[%s4720_s3] sm:$0xff] }
 0x972   : > { %v3154_v50 = vpop.eup %3153 }
 0x973   : > { %1510 = vrot.lane.b32.xlu0 %v1505_v19, %s3495_s28  ;;  %v1503_v16 = vmul.f32 %v3154_v50, %v3148_v9  ;;  %v1604_v9 = vld [vmem:[%s4720_s3 + $0x8] sm:$0xff] }
 0x975   : > { %1508 = vrot.lane.b32.xlu1 %v1503_v16, %s3495_s28 }
 0x9e5   : > { %v1511_v25 = vpop.permute.xlu0 %1510 }
 0x9e7   : > { %v1509_v7 = vpop.permute.xlu1 %1508 }
 0x9e8   : > { %2941 = vmatprep.mubr.msk.f32.mxu0 %vm800_vm1, %v1509_v7  ;;  %v1617_v7 = vld [vmem:[%s4720_s3 + $0x70] sm:$0xff] }
 0x9e9   : > { %2942 = vmatmul.mubr.msk.f32.vlgmr.msra.gmra.mxu0 %vm800_vm1, %v1511_v25 }
 0x9ea   : > { %1689 = vmatprep.mubr.f32.mxu0 %v4800_v13  ;;  %1650 = vmatpush1.msra.mxu0 %v1615_v15 }
 0x9eb   : > { %1651 = vmatprep.subr.mxu0 %v1612_v3  ;;  %v1613_v3 = vld [vmem:[%s4720_s3 + $0x50] sm:$0xff] }
 0x9ec   : > { %1652 = vmatpush1.msra.mxu0 %v1611_v5  ;;  %v1610_v5 = vld [vmem:[%s4720_s3 + $0x38] sm:$0xff] }
 0x9ed   : > { %1653 = vmatprep.subr.mxu0 %v1608_v0  ;;  %v1609_v0 = vld [vmem:[%s4720_s3 + $0x30] sm:$0xff] }
 0x9ee   : > { %1654 = vmatpush1.msra.mxu0 %v1607_v42 }
 0x9ef   : > { %1655 = vmatprep.subr.mxu0 %v1604_v9  ;;  %v1606_v9 = vld [vmem:[%s4720_s3 + $0x18] sm:$0xff] }
 0x9f0   : > { %1656 = vmatpush1.msra.mxu0 %v1603_v46  ;;  %v1605_v46 = vld [vmem:[%s4720_s3 + $0x10] sm:$0xff] }
 0x9f1   : > { %1726 = vmatprep.subr.mxu0 %v1618_v29  ;;  %v4809_v29 = vld [vmem:[#allocation27_spill] sm:$0xff] }
 0xaa9   : > { %v2943_v18 = vpop.f32.mrf.mxu0 }
 0xaaa   : > { %v1594_v38 = vmin.f32 %v2943_v18, 0.0  ;;  %vm1592_vm12 = vcmp.gt.f32.partialorder %v2943_v18, 0.0 }
 0xaab   : > { %v1582_v1 = vpop.f32.mrf.mxu0 }
 0xaac   : > { %v1597_v17 = vmul.f32 1.442695, %v1594_v38  ;;  %v1593_v62 = vmin.f32 %v1582_v1, 0.0  ;;  %vm1591_vm11 = vcmp.gt.f32.partialorder %v1582_v1, 0.0 }
 0xaae   : > { %v1595_v32 = vmul.f32 1.442695, %v1593_v62  ;;  %3155 = vpow2.f32 %v1597_v17  ;;  %v4812_v62 = vld [vmem:[#allocation30_spill] sm:$0xff] }
 0xab0   : > { %3157 = vpow2.f32 %v1595_v32 }
 0xabb   : > { %v3156_v19 = vpop.eup %3155 }
 0xabc   : > { %v2714_v15 = vadd.f32 -1.0, %v3156_v19 }
 0xabd   : > { %v3158_v50 = vpop.eup %3157 }
 0xabe   : > { %v2713_v16 = vadd.f32 -1.0, %v3158_v50  ;;  %v1602_v42 = vsel %vm1592_vm12, %v2943_v18, %v2714_v15  ;;  %v4810_v18 = vld [vmem:[#allocation28_spill] sm:$0xff] }
 0xac0   : > { %v1601_v25 = vsel %vm1591_vm11, %v1582_v1, %v2713_v16  ;;  %v4811_v1 = vld [vmem:[#allocation29_spill] sm:$0xff] }
 0xac1   : > { %2715 = vmatmul.mubr.msk.f32.vlgmr.msra.gmra.mxu0 %vm635_vm0, %v1601_v25 }
 0xac2   : > { %1727 = vmatpush1.msra.mxu0 %v1617_v7  ;;  %1695 = vmatprep.mubr.f32.mxu0 %v4800_v13 }
 0xac3   : > { %1728 = vmatprep.subr.mxu0 %v1614_v11  ;;  %v1865_v11 = vld [vmem:[#allocation8 + $0x8] sm:$0xff] }
 0xac4   : > { %1729 = vmatpush1.msra.mxu0 %v1613_v3 }
 0xac5   : > { %2716 = vmatmul.mubr.msk.f32.gmra.mxu0 %vm635_vm0, %v1602_v42  ;;  %1730 = vmatprep.subr.mxu0 %v1610_v5  ;;  %v1864_v5 = vld [vmem:[#allocation8] sm:$0xff] }
 0xac6   : > { %1731 = vmatpush1.msra.mxu0 %v1609_v0  ;;  %1766 = vmatprep.mubr.f32.mxu0 %v4800_v13 }
 0xac7   : > { %1732 = vmatprep.subr.mxu0 %v1606_v9 }
 0xac8   : > { %1733 = vmatpush1.msra.mxu0 %v1605_v46 }
 0xac9   : > { %2717 = vmatmul.mubr.msk.f32.vlgmr.msra.gmra.mxu0 %vm635_vm0, %v1601_v25  ;;  %2951 = vmatprep.subr.mxu0 %v4115_v23 }
 0xaca   : > { %1772 = vmatprep.mubr.f32.mxu0 %v4800_v13  ;;  %2952 = vmatpush3.msra.mxu0 %v4115_v23 }
 0xacb   : > { %2953 = vmatprep.subr.mxu0 %v4120_v58 }
 0xacc   : > { %2954 = vmatpush3.msra.mxu0 %v4120_v58 }
 0xacd   : > { %2718 = vmatmul.mubr.msk.f32.gmra.mxu0 %vm635_vm0, %v1602_v42  ;;  %2955 = vmatprep.subr.mxu0 %v4127_v20 }
 0xace   : > { %2956 = vmatpush3.msra.mxu0 %v4127_v20 }
 0xacf   : > { %2957 = vmatprep.subr.mxu0 %v4134_v21 }
 0xad0   : > { %2958 = vmatpush3.msra.mxu0 %v4134_v21 }
 0xad1   : > { %2959 = vmatprep.subr.mxu0 %v4141_v22 }
 0xad2   : > { %2960 = vmatpush3.msra.mxu0 %v4141_v22 }
 0xad3   : > { %2961 = vmatprep.subr.mxu0 %v4152_v30 }
 0xad4   : > { %2962 = vmatpush3.msra.mxu0 %v4152_v30 }
 0xad5   : > { %2963 = vmatprep.subr.mxu0 %v4159_v24 }
 0xad6   : > { %2964 = vmatpush3.msra.mxu0 %v4159_v24 }
 0xad7   : > { %2965 = vmatprep.subr.mxu0 %v4166_v26 }
 0xad8   : > { %2966 = vmatpush3.msra.mxu0 %v4166_v26 }
 0xad9   : > { %2967 = vmatprep.subr.mxu0 %v4173_v36 }
 0xada   : > { %2968 = vmatpush3.msra.mxu0 %v4173_v36 }
 0xadb   : > { %2969 = vmatprep.subr.mxu0 %v4180_v40 }
 0xadc   : > { %2970 = vmatpush3.msra.mxu0 %v4180_v40 }
 0xadd   : > { %2971 = vmatprep.subr.mxu0 %v4185_v44 }
 0xade   : > { %2972 = vmatpush3.msra.mxu0 %v4185_v44 }
 0xadf   : > { %2973 = vmatprep.subr.mxu0 %v4192_v48 }
 0xae0   : > { %2974 = vmatpush3.msra.mxu0 %v4192_v48 }
 0xae1   : > { %2975 = vmatprep.subr.mxu0 %v4199_v52 }
 0xae2   : > { %2976 = vmatpush3.msra.mxu0 %v4199_v52 }
 0xae3   : > { %2977 = vmatprep.subr.mxu0 %v4206_v54 }
 0xae4   : > { %2978 = vmatpush3.msra.mxu0 %v4206_v54  ;;  %v4806_v54 = vld [vmem:[#allocation24_spill] sm:$0xff] }
 0xae5   : > { %2979 = vmatprep.subr.mxu0 %v4213_v56 }
 0xae6   : > { %2980 = vmatpush3.msra.mxu0 %v4213_v56  ;;  %v4807_v56 = vld [vmem:[#allocation25_spill] sm:$0xff] }
 0xae7   : > { %2981 = vmatprep.subr.mxu0 %v4220_v60 }
 0xae8   : > { %2982 = vmatpush3.msra.mxu0 %v4220_v60  ;;  %v4808_v60 = vld [vmem:[#allocation26_spill] sm:$0xff] }
 0xb81   : > { %v4467_v23 = vpop.f32.mrf.mxu0 }
 0xb82   : > { %v1957_v32 = vmul.f32 %v4467_v23, %v4812_v62 }
 0xb83   : > { %v4469_v58 = vpop.f32.mrf.mxu0 }
 0xb84   : > { %v1986_v52 = vmul.f32 %v4469_v58, %v3898_v35  ;;  %v1958_v17 = vmul.f32 %v4469_v58, %v4811_v1 }
 0xb85   : > { %v4471_v20 = vpop.f32.mrf.mxu0 }
 0xb86   : > { %v1987_v48 = vmul.f32 %v4471_v20, %v3891_v33  ;;  %v1982_v33 = vmul.f32 %v4469_v58, %v3928_v43  ;;  %v1959_v38 = vmul.f32 %v4471_v20, %v4810_v18  ;;  %v2090_v18 = vld [vmem:[%s4813_s23] sm:$0xff] }
 0xb87   : > { %v4473_v21 = vpop.f32.mrf.mxu0 }
 0xb88   : > { %v1988_v44 = vmul.f32 %v4473_v21, %v3885_v31  ;;  %v1983_v31 = vmul.f32 %v4471_v20, %v3921_v41  ;;  %v1980_v35 = vmul.f32 %v4473_v21, %v3943_v47  ;;  %v1977_v41 = vmul.f32 %v4467_v23, %v3964_v53 }
 0xb89   : > { %v4475_v22 = vpop.f32.mrf.mxu0  ;;  %v1976_v43 = vmul.f32 %v4473_v21, %v3971_v55  ;;  %v1974_v47 = vmul.f32 %v4469_v58, %v3985_v59  ;;  %v1971_v53 = vmul.f32 %v4471_v20, %v4006_v2  ;;  %v1970_v55 = vmul.f32 %v4469_v58, %v4013_v4  ;;  %v4805_v4 = vld [vmem:[#allocation23_spill] sm:$0xff] }
 0xb8a   : > { %v1968_v59 = vmul.f32 %v4473_v21, %v4027_v8  ;;  %v1965_v2 = vmul.f32 %v4467_v23, %v4048_v14  ;;  %v1963_v8 = vmul.f32 %v4471_v20, %v4806_v54  ;;  %v1960_v14 = vmul.f32 %v4473_v21, %v4809_v29  ;;  %v2094_v54 = vld [vmem:[%s4813_s23 + $0x20] sm:$0xff]  ;;  %v2091_v29 = vld [vmem:[%s4813_s23 + $0x8] sm:$0xff] }
 0xb8b   : > { %v1770_v30 = vpop.f32.mrf.mxu0 }
 0xb8c   : > { %v1779_v40 = vmul.f32 %v1770_v30, %v3879_v28  ;;  %v1984_v28 = vmul.f32 %v4473_v21, %v3912_v39  ;;  %v1978_v39 = vmul.f32 %v4469_v58, %v3957_v51  ;;  %v1972_v51 = vmul.f32 %v4473_v21, %v3999_v63 }
 0xb8d   : > { %v4477_v24 = vpop.f32.mrf.mxu0  ;;  %v1966_v63 = vmul.f32 %v4469_v58, %v4041_v12  ;;  %v1961_v12 = vmul.f32 %v4467_v23, %v4808_v60  ;;  %v2092_v60 = vld [vmem:[%s4813_s23 + $0x10] sm:$0xff] }
 0xb8f   : > { %v1776_v26 = vpop.f32.mrf.mxu0 }
 0xb90   : > { %v1780_v36 = vmul.f32 %v1776_v26, %v3877_v27  ;;  %v1985_v27 = vmul.f32 %v4467_v23, %v3905_v37  ;;  %v1979_v37 = vmul.f32 %v4471_v20, %v3950_v49  ;;  %v1973_v49 = vmul.f32 %v4467_v23, %v3992_v61  ;;  %v2121_v26 = vld [vmem:[%s4813_s23 + $0xf8] sm:$0xff] }
 0xb91   : > { %v1967_v61 = vmul.f32 %v4471_v20, %v4034_v10  ;;  %v1962_v10 = vmul.f32 %v4469_v58, %v4807_v56  ;;  %2831 = vmatprep.subr.mxu0 %v2121_v26  ;;  %v2093_v56 = vld [vmem:[%s4813_s23 + $0x18] sm:$0xff] }
 0xb92   : > { %2944 = vmatprep.subr.mxu1 %v1780_v36 }
 0xb93   : > { %2945 = vmatpush3.msra.mxu1 %v1780_v36  ;;  %v2105_v36 = vld [vmem:[%s4813_s23 + $0x78] sm:$0xff] }
 0xb94   : > { %2946 = vmatprep.subr.mxu1 %v1779_v40 }
 0xb95   : > { %2947 = vmatpush3.msra.mxu1 %v1779_v40  ;;  %v2120_v40 = vld [vmem:[%s4813_s23 + $0xf0] sm:$0xff] }
 0xb96   : > { %2949 = vmatmul.mubr.msk.f32.vlgmr.msra.gmra.mxu1 %vm800_vm1, %v3893_v34  ;;  %1989 = vmatprep.subr.mxu1 %v1988_v44  ;;  %v1981_v34 = vmul.f32 %v4467_v23, %v3936_v45  ;;  %v1975_v45 = vmul.f32 %v4471_v20, %v3978_v57  ;;  %v1969_v57 = vmul.f32 %v4467_v23, %v4020_v6  ;;  %v2104_v44 = vld [vmem:[%s4813_s23 + $0x70] sm:$0xff] }
 0xb97   : > { %1990 = vmatpush1.msra.mxu1 %v1987_v48  ;;  %2053 = vmatprep.mubr.f32.mxu1 %v4800_v13  ;;  %v1964_v6 = vmul.f32 %v4473_v21, %v4805_v4  ;;  %v2119_v48 = vld [vmem:[%s4813_s23 + $0xe8] sm:$0xff] }
 0xb98   : > { %1991 = vmatprep.subr.mxu1 %v1986_v52  ;;  %v2103_v52 = vld [vmem:[%s4813_s23 + $0x68] sm:$0xff] }
 0xb99   : > { %1992 = vmatpush1.msra.mxu1 %v1985_v27  ;;  %v2118_v27 = vld [vmem:[%s4813_s23 + $0xe0] sm:$0xff]  ;;  %v2095_v4 = vld [vmem:[%s4813_s23 + $0x28] sm:$0xff] }
 0xb9a   : > { %1993 = vmatprep.subr.mxu1 %v1984_v28 }
 0xb9b   : > { %1994 = vmatpush1.msra.mxu1 %v1983_v31 }
 0xb9c   : > { %1995 = vmatprep.subr.mxu1 %v1982_v33 }
 0xb9d   : > { %1996 = vmatpush1.msra.mxu1 %v1981_v34 }
 0xb9e   : > { %1997 = vmatprep.subr.mxu1 %v1980_v35 }
 0xb9f   : > { %1998 = vmatpush1.msra.mxu1 %v1979_v37 }
 0xba0   : > { %1999 = vmatprep.subr.mxu1 %v1978_v39  ;;  %v3187_v39 = vld [vmem:[#allocation14] sm:$0xff] }
 0xba1   : > { %2000 = vmatpush1.msra.mxu1 %v1977_v41  ;;  %v2102_v41 = vld [vmem:[%s4813_s23 + $0x60] sm:$0xff] }
 0xba2   : > { %2001 = vmatprep.subr.mxu1 %v1976_v43  ;;  %v2117_v43 = vld [vmem:[%s4813_s23 + $0xd8] sm:$0xff] }
 0xba3   : > { %2002 = vmatpush1.msra.mxu1 %v1975_v45  ;;  %v2101_v45 = vld [vmem:[%s4813_s23 + $0x58] sm:$0xff] }
 0xba4   : > { %2003 = vmatprep.subr.mxu1 %v1974_v47  ;;  %v2100_v47 = vld [vmem:[%s4813_s23 + $0x50] sm:$0xff] }
 0xba5   : > { %2004 = vmatpush1.msra.mxu1 %v1973_v49  ;;  %v2115_v49 = vld [vmem:[%s4813_s23 + $0xc8] sm:$0xff] }
 0xba6   : > { %2005 = vmatprep.subr.mxu1 %v1972_v51  ;;  %v2099_v51 = vld [vmem:[%s4813_s23 + $0x48] sm:$0xff] }
 0xba7   : > { %2006 = vmatpush1.msra.mxu1 %v1971_v53  ;;  %v2114_v53 = vld [vmem:[%s4813_s23 + $0xc0] sm:$0xff] }
 0xba8   : > { %2007 = vmatprep.subr.mxu1 %v1970_v55  ;;  %v2098_v55 = vld [vmem:[%s4813_s23 + $0x40] sm:$0xff] }
 0xba9   : > { %2008 = vmatpush1.msra.mxu1 %v1969_v57  ;;  %v2113_v57 = vld [vmem:[%s4813_s23 + $0xb8] sm:$0xff] }
 0xbaa   : > { %2009 = vmatprep.subr.mxu1 %v1968_v59  ;;  %v2097_v59 = vld [vmem:[%s4813_s23 + $0x38] sm:$0xff] }
 0xbab   : > { %2010 = vmatpush1.msra.mxu1 %v1967_v61  ;;  %v2112_v61 = vld [vmem:[%s4813_s23 + $0xb0] sm:$0xff] }
 0xbac   : > { %2011 = vmatprep.subr.mxu1 %v1966_v63  ;;  %v2096_v63 = vld [vmem:[%s4813_s23 + $0x30] sm:$0xff] }
 0xbad   : > { %2012 = vmatpush1.msra.mxu1 %v1965_v2  ;;  %v2111_v2 = vld [vmem:[%s4813_s23 + $0xa8] sm:$0xff] }
 0xbae   : > { %2013 = vmatprep.subr.mxu1 %v1964_v6  ;;  %v2110_v6 = vld [vmem:[%s4813_s23 + $0xa0] sm:$0xff] }
 0xbaf   : > { %2014 = vmatpush1.msra.mxu1 %v1963_v8  ;;  %v2109_v8 = vld [vmem:[%s4813_s23 + $0x98] sm:$0xff] }
 0xbb0   : > { %2015 = vmatprep.subr.mxu1 %v1962_v10  ;;  %v2108_v10 = vld [vmem:[%s4813_s23 + $0x90] sm:$0xff] }
 0xbb1   : > { %2016 = vmatpush1.msra.mxu1 %v1961_v12  ;;  %v2107_v12 = vld [vmem:[%s4813_s23 + $0x88] sm:$0xff] }
 0xbb2   : > { %2017 = vmatprep.subr.mxu1 %v1960_v14  ;;  %v2106_v14 = vld [vmem:[%s4813_s23 + $0x80] sm:$0xff] }
 0xbb3   : > { %2018 = vmatpush1.msra.mxu1 %v1959_v38 }
 0xbb4   : > { %2019 = vmatprep.subr.mxu1 %v1958_v17 }
 0xbb5   : > { %2020 = vmatpush1.msra.mxu1 %v1957_v32 }
 0xc56   : > { %v2950_v19 = vpop.f32.mrf.mxu1 }
 0xc57   : > { %v1857_v50 = vadd.f32 %v2950_v19, %v4477_v24 }
 0xc58   : > { %v1847_v16 = vpop.f32.mrf.mxu1 }
 0xc59   : > { %v1861_v7 = vmul.f32 0.2, %v1857_v50  ;;  %v1856_v25 = vadd.f32 %v1847_v16, %v4475_v22  ;;  %vm1859_vm13 = vcmp.gt.f32.partialorder %v1857_v50, 0.0 }
 0xc5b   : > { %v1860_v15 = vmul.f32 0.2, %v1856_v25  ;;  %v1863_v3 = vsel %vm1859_vm13, %v1857_v50, %v1861_v7  ;;  %vm1858_vm14 = vcmp.gt.f32.partialorder %v1856_v25, 0.0 }
 0xc5c   : > { %v1867_v0 = vadd.f32 %v1865_v11, %v1863_v3 }
 0xc5d   : > { %v1862_v42 = vsel %vm1858_vm14, %v1856_v25, %v1860_v15 }
 0xc5e   : > { %1870 = vmax.xlane.f32.xlu0 %v1867_v0  ;;  %v1866_v9 = vadd.f32 %v1864_v5, %v1862_v42 }
 0xc60   : > { %1868 = vmax.xlane.f32.xlu1 %v1866_v9 }
 0xce7   : > { %v1871_v46 = vpop.xlane.xlu0 %1870 }
 0xce8   : > { %v1873_v23 = vsub.f32 %v1867_v0, %v1871_v46 }
 0xce9   : > { %v1869_v58 = vpop.xlane.xlu1 %1868 }
 0xcea   : > { %v1872_v20 = vsub.f32 %v1866_v9, %v1869_v58  ;;  %v1876_v21 = vmul.f32 1.442695, %v1873_v23 }
 0xcec   : > { %v1874_v30 = vmul.f32 1.442695, %v1872_v20 }
 0xcee   : > { %3159 = vpow2.f32 %v1874_v30 }
 0xcef   : > { %3161 = vpow2.f32 %v1876_v21 }
 0xcfb   : > { %v3160_v22 = vpop.eup %3159 }
 0xcfc   : > { %v3162_v24 = vpop.eup %3161  ;;  %2983 = vmatprep.mubr.f32.mxu0 %v3160_v22 }
 0xcfd   : > { %2984 = vmatmul.mubr.f32.vlgmr.msra.gmra.mxu0 %v3162_v24 }
 0xcfe   : > { %2832 = vmatpush3.msra.mxu0 %v2105_v36 }
 0xcff   : > { %2833 = vmatprep.subr.mxu0 %v2120_v40 }
 0xd00   : > { %2834 = vmatpush3.msra.mxu0 %v2104_v44  ;;  %v4814_v44 = vld [vmem:[#allocation32_spill] sm:$0xff] }
 0xd01   : > { %2835 = vmatprep.subr.mxu0 %v2119_v48 }
 0xd02   : > { %2836 = vmatpush3.msra.mxu0 %v2103_v52 }
 0xd03   : > { %2837 = vmatprep.subr.mxu0 %v2118_v27 }
 0xd04   : > { %2838 = vmatpush3.msra.mxu0 %v2102_v41 }
 0xd05   : > { %2839 = vmatprep.subr.mxu0 %v2117_v43 }
 0xd06   : > { %2840 = vmatpush3.msra.mxu0 %v2101_v45  ;;  %v2299_v45 = vld [vmem:[#allocation10 + $0x8] sm:$0xff] }
 0xdbd   : > { %v2985_v28 = vpop.f32.mrf.mxu0 }
 0xdbf   : > { %v1944_v31 = vpop.f32.mrf.mxu0 }
 0xdc0   : > { %3163 = vrcp.f32 %v1944_v31 }
 0xdc1   : > { %3165 = vrcp.f32 %v2985_v28  ;;  %v4815_v28 = vld [vmem:[#allocation31_spill] sm:$0xff] }
 0xdcd   : > { %v3164_v33 = vpop.eup %3163 }
 0xdce   : > { %v1954_v34 = vmul.f32 %v3164_v33, %v3160_v22  ;;  %v3166_v35 = vpop.eup %3165 }
 0xdcf   : > { %v1956_v37 = vmul.f32 %v3166_v35, %v3162_v24  ;;  %v3188_v35 = vld [vmem:[#allocation14 + $0x8] sm:$0xff] }
 0xdd0   : > { %2054 = vmatmul.mubr.f32.vlgmr.msra.gmra.mxu1 %v1954_v34 }
 0xdd1   : > { %2059 = vmatprep.mubr.f32.mxu1 %v4800_v13  ;;  %v2116_v13 = vld [vmem:[%s4813_s23 + $0xd0] sm:$0xff] }
 0xdd2   : > { %2841 = vmatprep.subr.mxu0 %v2116_v13  ;;  %v2298_v13 = vld [vmem:[#allocation10] sm:$0xff] }
 0xdd3   : > { %2842 = vmatpush3.msra.mxu0 %v2100_v47 }
 0xdd4   : > { %2060 = vmatmul.mubr.f32.gmra.mxu1 %v1956_v37  ;;  %2843 = vmatprep.subr.mxu0 %v2115_v49  ;;  %v4816_v37 = vld [vmem:[#allocation33_spill] sm:$0xff] }
 0xdd5   : > { %2990 = vmatprep.mubr.msk.f32.mxu1 %vm800_vm1, %v3187_v39  ;;  %2844 = vmatpush3.msra.mxu0 %v2099_v51  ;;  %v4817_v39 = vld [vmem:[#allocation34_spill] sm:$0xff] }
 0xdd6   : > { %2845 = vmatprep.subr.mxu0 %v2114_v53 }
 0xdd7   : > { %2846 = vmatpush3.msra.mxu0 %v2098_v55 }
 0xdd8   : > { %2847 = vmatprep.subr.mxu0 %v2113_v57 }
 0xdd9   : > { %2848 = vmatpush3.msra.mxu0 %v2097_v59 }
 0xdda   : > { %2849 = vmatprep.subr.mxu0 %v2112_v61 }
 0xddb   : > { %2850 = vmatpush3.msra.mxu0 %v2096_v63 }
 0xddc   : > { %2851 = vmatprep.subr.mxu0 %v2111_v2 }
 0xddd   : > { %2852 = vmatpush3.msra.mxu0 %v2095_v4 }
 0xdde   : > { %2853 = vmatprep.subr.mxu0 %v2110_v6 }
 0xddf   : > { %2854 = vmatpush3.msra.mxu0 %v2094_v54 }
 0xde0   : > { %2855 = vmatprep.subr.mxu0 %v2109_v8 }
 0xde1   : > { %2856 = vmatpush3.msra.mxu0 %v2093_v56 }
 0xde2   : > { %2857 = vmatprep.subr.mxu0 %v2108_v10 }
 0xde3   : > { %2858 = vmatpush3.msra.mxu0 %v2092_v60 }
 0xde4   : > { %2859 = vmatprep.subr.mxu0 %v2107_v12 }
 0xde5   : > { %2860 = vmatpush3.msra.mxu0 %v2091_v29 }
 0xde6   : > { %2861 = vmatprep.subr.mxu0 %v2106_v14 }
 0xde7   : > { %2862 = vmatpush3.msra.mxu0 %v2090_v18 }
 0xe90   : > { %v2055_v38 = vpop.f32.mrf.mxu1 }
 0xe91   : > { %v2070_v1 = vmin.f32 %v2055_v38, 0.0  ;;  %vm2066_vm2 = vcmp.gt.f32.partialorder %v2055_v38, 0.0 }
 0xe92   : > { %v2057_v17 = vpop.f32.mrf.mxu1 }
 0xe93   : > { %v2074_v62 = vmul.f32 1.442695, %v2070_v1  ;;  %v2071_v32 = vmin.f32 %v2057_v17, 0.0  ;;  %vm2067_vm15 = vcmp.gt.f32.partialorder %v2057_v17, 0.0 }
 0xe94   : > { %v2061_v19 = vpop.f32.mrf.mxu1 }
 0xe95   : > { %3167 = vpow2.f32 %v2074_v62  ;;  %v2076_v50 = vmul.f32 1.442695, %v2071_v32  ;;  %v2072_v16 = vmin.f32 %v2061_v19, 0.0  ;;  %vm2068_vm4 = vcmp.gt.f32.partialorder %v2061_v19, 0.0 }
 0xe96   : > { %v2063_v7 = vpop.f32.mrf.mxu1 }
 0xe97   : > { %3169 = vpow2.f32 %v2076_v50  ;;  %v2078_v25 = vmul.f32 1.442695, %v2072_v16  ;;  %v2073_v11 = vmin.f32 %v2063_v7, 0.0  ;;  %vm2069_vm3 = vcmp.gt.f32.partialorder %v2063_v7, 0.0 }
 0xe99   : > { %3171 = vpow2.f32 %v2078_v25  ;;  %v2080_v15 = vmul.f32 1.442695, %v2073_v11 }
 0xe9b   : > { %3173 = vpow2.f32 %v2080_v15 }
 0xea2   : > { %v3168_v3 = vpop.eup %3167 }
 0xea3   : > { %v2721_v0 = vadd.f32 -1.0, %v3168_v3 }
 0xea4   : > { %v3170_v5 = vpop.eup %3169 }
 0xea5   : > { %v2722_v42 = vadd.f32 -1.0, %v3170_v5  ;;  %v2086_v58 = vsel %vm2066_vm2, %v2055_v38, %v2721_v0 }
 0xea6   : > { %v3172_v9 = vpop.eup %3171 }
 0xea7   : > { %v2087_v46 = vsel %vm2067_vm15, %v2057_v17, %v2722_v42  ;;  %v2723_v20 = vadd.f32 -1.0, %v3172_v9 }
 0xea8   : > { %v3174_v23 = vpop.eup %3173  ;;  %2186 = vmatprep.mubr.f32.mxu0 %v2087_v46 }
 0xea9   : > { %2187 = vmatmul.mubr.f32.vlgmr.msra.gmra.mxu0 %v2086_v58  ;;  %v2724_v21 = vadd.f32 -1.0, %v3174_v23  ;;  %v2088_v22 = vsel %vm2068_vm4, %v2061_v19, %v2723_v20 }
 0xeab   : > { %v2089_v30 = vsel %vm2069_vm3, %v2063_v7, %v2724_v21 }
 0xeac   : > { %2191 = vmatprep.mubr.f32.mxu0 %v2089_v30 }
 0xead   : > { %2192 = vmatmul.mubr.f32.gmra.mxu0 %v2088_v22 }
 0xf69   : > { %v2863_v24 = vpop.f32.mrf.mxu0 }
 0xf6b   : > { %v2864_v26 = vpop.f32.mrf.mxu0 }
 0xf6c   : > { %v4648_v36 = vadd.f32 %v2864_v26, %v2863_v24 }
 0xf6d   : > { %v2866_v40 = vpop.f32.mrf.mxu0 }
 0xf6e   : > { %v2197_v48 = vmul.f32 %v4648_v36, %v4814_v44 }
 0xf6f   : > { %v2867_v52 = vpop.f32.mrf.mxu0 }
 0xf70   : > { %v2868_v27 = vadd.f32 %v2867_v52, %v2866_v40  ;;  %2201 = vrot.lane.b32.xlu1 %v2197_v48, %s3493_s22 }
 0xf72   : > { %v2198_v31 = vmul.f32 %v2868_v27, %v4815_v28 }
 0xf74   : > { %2203 = vrot.lane.b32.xlu0 %v2198_v31, %s3493_s22  ;;  %s2733_s22 = sshll.u32 %s3598_s24, 4  ;;  %s3405_s24 = scalar_lea.vmem %s3404_s26, 32 }
 0xf75   : > { %s2540_s6 = scalar_lea.hbm %s4818_s14, %s2733_s22 }
 0xfe2   : > { %v2202_v34 = vpop.permute.xlu1 %2201 }
 0xfe6   : > { %v2204_v33 = vpop.permute.xlu0 %2203 }
 0xfe7   : > { %2986 = vmatprep.subr.mxu1 %v2204_v33 }
 0xfe8   : > { %2987 = vmatpush3.msra.mxu1 %v2204_v33 }
 0xfe9   : > { %2988 = vmatprep.subr.mxu1 %v2202_v34 }
 0xfea   : > { %2989 = vmatpush3.msra.mxu1 %v2202_v34 }
 0xfeb   : > { %2991 = vmatmul.mubr.msk.f32.vlgmr.msra.gmra.mxu1 %vm800_vm1, %v3188_v35  ;;  %2993 = vmatprep.subr.mxu1 %v4816_v37 }
 0xfec   : > { %2994 = vmatpush3.msra.mxu1 %v4816_v37 }
 0xfed   : > { %2995 = vmatprep.subr.mxu1 %v4817_v39 }
 0xfee   : > { %2996 = vmatpush3.msra.mxu1 %v4817_v39 }
 0xfef   : > { %3000 = vmatprep.subr.mxu1 %v2868_v27 }
0x10ab   : > { %v2992_v41 = vpop.f32.mrf.mxu1 }
0x10ac   : > { %2286 = vrot.lane.b32.xlu0 %v2992_v41, %s3494_s5 }
0x10ad   : > { %v2273_v43 = vpop.f32.mrf.mxu1 }
0x10ae   : > { %2284 = vrot.lane.b32.xlu1 %v2273_v43, %s3494_s5 }
0x10b0   : > { %2304 = vrot.lane.b32.xlu0 %v2299_v45, %s3494_s5 }
0x10b2   : > { %2302 = vrot.lane.b32.xlu1 %v2298_v13, %s3494_s5 }
0x111e   : > { %v2287_v47 = vpop.permute.xlu0 %2286 }
0x111f   : > { %v2291_v49 = vadd.f32 %v2868_v27, %v2287_v47 }
0x1120   : > { %v2285_v51 = vpop.permute.xlu1 %2284 }
0x1121   : > { %v2295_v53 = vmul.f32 0.2, %v2291_v49  ;;  %v2290_v55 = vadd.f32 %v4648_v36, %v2285_v51  ;;  %vm2293_vm5 = vcmp.gt.f32.partialorder %v2291_v49, 0.0 }
0x1122   : > { %v2305_v57 = vpop.permute.xlu0 %2304 }
0x1123   : > { %v2294_v59 = vmul.f32 0.2, %v2290_v55  ;;  %v2297_v61 = vsel %vm2293_vm5, %v2291_v49, %v2295_v53  ;;  %vm2292_vm6 = vcmp.gt.f32.partialorder %v2290_v55, 0.0 }
0x1124   : > { %v2309_v63 = vadd.f32 %v2305_v57, %v2297_v61  ;;  %v2303_v2 = vpop.permute.xlu1 %2302 }
0x1125   : > { %v2296_v4 = vsel %vm2292_vm6, %v2290_v55, %v2294_v59 }
0x1126   : > { %v2308_v6 = vadd.f32 %v2303_v2, %v2296_v4  ;;  %v2313_v54 = vsel %vm1394_vm10, %v2309_v63, -inf }
0x1127   : > { %2314 = vmax.xlane.f32.xlu0 %v2313_v54 }
0x1128   : > { %v2310_v8 = vsel %vm1394_vm10, %v2308_v6, -inf }
0x1129   : > { %2311 = vmax.xlane.f32.xlu1 %v2310_v8 }
0x11b0   : > { %v2315_v56 = vpop.xlane.xlu0 %2314 }
0x11b1   : > { %v2317_v10 = vsub.f32 %v2309_v63, %v2315_v56 }
0x11b2   : > { %v2312_v60 = vpop.xlane.xlu1 %2311 }
0x11b3   : > { %v2320_v12 = vmul.f32 1.442695, %v2317_v10  ;;  %v2316_v29 = vsub.f32 %v2308_v6, %v2312_v60 }
0x11b5   : > { %3175 = vpow2.f32 %v2320_v12  ;;  %v2318_v14 = vmul.f32 1.442695, %v2316_v29 }
0x11b7   : > { %3177 = vpow2.f32 %v2318_v14 }
0x11c2   : > { %v3176_v18 = vpop.eup %3175 }
0x11c3   : > { %2326 = vrot.lane.b32.xlu1 %v3176_v18, %s3495_s28 }
0x11c4   : > { %v3178_v38 = vpop.eup %3177 }
0x11c5   : > { %2324 = vrot.lane.b32.xlu0 %v3178_v38, %s3495_s28 }
0x1235   : > { %v2327_v17 = vpop.permute.xlu1 %2326 }
0x1237   : > { %v2325_v1 = vpop.permute.xlu0 %2324 }
0x1238   : > { %2997 = vmatprep.mubr.msk.f32.mxu1 %vm800_vm1, %v2325_v1 }
0x1239   : > { %2998 = vmatmul.mubr.msk.f32.vlgmr.msra.gmra.mxu1 %vm800_vm1, %v2327_v17 }
0x123a   : > { %3001 = vmatpush3.msra.mxu1 %v2868_v27 }
0x123b   : > { %3002 = vmatprep.subr.mxu1 %v4648_v36 }
0x123c   : > { %3003 = vmatpush3.msra.mxu1 %v4648_v36 }
0x12f9   : > { %v2999_v62 = vpop.f32.mrf.mxu1 }
0x12fa   : > { %2411 = vrot.lane.b32.xlu0 %v2999_v62, %s3494_s5 }
0x12fb   : > { %v2398_v32 = vpop.f32.mrf.mxu1 }
0x12fc   : > { %2409 = vrot.lane.b32.xlu1 %v2398_v32, %s3494_s5  ;;  %s613_s5 = scalar_lea.vmem [#allocation16], %s3777_s12 }
0x136c   : > { %v2412_v19 = vpop.permute.xlu0 %2411 }
0x136d   : > { %3179 = vrcp.f32 %v2412_v19 }
0x136e   : > { %v2410_v50 = vpop.permute.xlu1 %2409 }
0x136f   : > { %3181 = vrcp.f32 %v2410_v50 }
0x137a   : > { %v3180_v16 = vpop.eup %3179 }
0x137b   : > { %v2418_v7 = vmul.f32 %v3180_v16, %v3176_v18 }
0x137c   : > { %v3182_v25 = vpop.eup %3181 }
0x137d   : > { %2423 = vrot.lane.b32.xlu0 %v2418_v7, %s3495_s28  ;;  %v2416_v11 = vmul.f32 %v3182_v25, %v3178_v38 }
0x137f   : > { %2421 = vrot.lane.b32.xlu1 %v2416_v11, %s3495_s28  ;;  %s2542_s28 = sshll.u32 %s613_s5, 4  ;;  %s2543_s28 = int_to_ptr.vmem [resolvable:$true] %s2542_s28 }
0x1380   : > { %s3399_s8 = scalar_lea.vmem %s2543_s28, 16  ;;  %p3406_p1 = scmp.lt.s32.totalorder %s2543_s28, %s3404_s26 }
0x1381   : > { %p3400_p10 = scmp.ne.s32.totalorder %s2543_s28, %s3399_s8  ;;  %p3407_p3 = scmp.lt.s32.totalorder %s3405_s24, %s3399_s8 }
0x1383   : > { %p3401_p12 = pnand %p3400_p10, %p4819_p9  ;;  %p3408_p4 = por %p3407_p3, %p3406_p1 }
0x1385   : > { %p3402_p13 = pneg %p3401_p12 }
0x1387   : > { %p3409_p8 = pnand %p3408_p4, %p3402_p13 }
0x13ef   : > { %v2424_v3 = vpop.permute.xlu0 %2423 }
0x13f1   : > { %v2422_v15 = vpop.permute.xlu1 %2421 }
0x13f2   : > { %3004 = vmatprep.mubr.msk.f32.mxu1 %vm800_vm1, %v2422_v15 }
0x13f3   : > { %3005 = vmatmul.mubr.msk.f32.vlgmr.msra.gmra.mxu1 %vm800_vm1, %v2424_v3  ;;  %vm2527_vm1 = vcmask 253952  }
0x14b3   : > { %v3006_v5 = vpop.f32.mrf.mxu1 }
0x14b4   : > { %v2507_v0 = vmin.f32 %v3006_v5, 0.0  ;;  %vm2505_vm7 = vcmp.gt.f32.partialorder %v3006_v5, 0.0 }
0x14b5   : > { %v2495_v42 = vpop.f32.mrf.mxu1 }
0x14b6   : > { %v2510_v9 = vmul.f32 1.442695, %v2507_v0  ;;  %v2506_v46 = vmin.f32 %v2495_v42, 0.0  ;;  %vm2504_vm8 = vcmp.gt.f32.partialorder %v2495_v42, 0.0 }
0x14b8   : > { %3183 = vpow2.f32 %v2510_v9  ;;  %v2508_v23 = vmul.f32 1.442695, %v2506_v46 }
0x14ba   : > { %3185 = vpow2.f32 %v2508_v23 }
0x14c5   : > { %v3184_v58 = vpop.eup %3183 }
0x14c6   : > { %v2732_v20 = vadd.f32 -1.0, %v3184_v58 }
0x14c7   : > { %v3186_v21 = vpop.eup %3185 }
0x14c8   : > { %v2515_v30 = vsel %vm2505_vm7, %v3006_v5, %v2732_v20  ;;  %v2731_v22 = vadd.f32 -1.0, %v3186_v21 }
0x14c9   : > { %v2517_v26 = vsel %vm635_vm0, %v2515_v30, 0.0 }
0x14ca   : > { %v2514_v24 = vsel %vm2504_vm8, %v2495_v42, %v2731_v22 }
0x14cb   : > { %v2516_v36 = vsel %vm635_vm0, %v2514_v24, 0.0 }
0x14cc   : > { %v2518_v40 = vadd.f32 %v2517_v26, %v2516_v36 }
0x14ce   : > { %v2519_v44 = vrot.slane %v2518_v40, 4 }
0x14d0   : > { %v2520_v48 = vadd.f32 %v2519_v44, %v2518_v40 }
0x14d2   : > { %v2521_v52 = vrot.slane %v2520_v48, 2 }
0x14d4   : > { %v2522_v27 = vadd.f32 %v2521_v52, %v2520_v48 }
0x14d6   : > { %v2523_v28 = vrot.slane %v2522_v27, 1 }
0x14d8   : > { %v2524_v31 = vadd.f32 %v2523_v28, %v2522_v27 }
0x14da   : > { %v2526_v33 = vmul.f32 0.0625, %v2524_v31 }
0x14dc   : > { %2528 = vst.msk [vmem:[%s613_s5] sm:$0x1] %vm2527_vm1, %v2526_v33 }
0x14dd   : > { %3412 = shalt.err (!%p3409_p8)
}
0x14de   : > { %s3413_s29 = scalar_lea.hbm %s2540_s6, 16  ;;  %s3417_s22 = scalar_lea.hbm %s4818_s14, 32 }
0x14df   : > { %p3414_p6 = scmp.ne.s32.totalorder %s2540_s6, %s3413_s29  ;;  %p3418_p0 = scmp.lt.s32.totalorder %s2540_s6, %s4818_s14 }
0x14e0   : > { %p3419_p2 = scmp.lt.s32.totalorder %s3417_s22, %s3413_s29 }
0x14e1   : > { %p3415_p11 = pnand %p3414_p6, %p4819_p9 }
0x14e2   : > { %p3420_p5 = por %p3419_p2, %p3418_p0 }
0x14e3   : > { %p3416_p7 = pneg %p3415_p11 }
0x14e5   : > { %p3421_p10 = pnand %p3420_p5, %p3416_p7 }
0x14e7   : > { %3424 = shalt.err (!%p3421_p10)
}
0x14e8   : > { %3037 = dma.vmem_to_hbm [thread:$0]  (%p4819_p9), %s2543_s28, 16, %s2540_s6, %s2530_s7  }
0x14e9 PF: > { %s2554_s17 = sand.u32 1, %s3467_s18   ;;  %p4820_p12 = scmp.ne.s32.totalorder %s4778_s27, 0 }
0x14ea   : > { %p4821_p13 = scmp.ge.s32.totalorder %s3479_s21, 2  ;;  %s2555_s8 = scalar_lea.sflag [#allocation4], %s2554_s17 }
0x14ec   : > { %p3066_p1 = pnand %p4821_p13, %p4820_p12 }
0x14ee   : > { %p3067_p3 = pneg %p3066_p1 }
0x14f0   : > { %3462 = dma.done.wait (%p3067_p3), %s2555_s8, 16  }
0x14f1   : > { %3464 = vsyncadd (%p3067_p3), %s2555_s8, 4294967280  ;;  %p32_p4 = scmp.ge.s32.totalorder %s3708_s16, 4   ;;  %s4822_s18 = smov %s3471_s19 }
0x14f2   : > { %s4823_s19 = smov %s3475_s20  ;;  %s4824_s20 = smov %s3720_s30 }
0x14f3   : > { %s4825_s21 = smov %s3708_s16  ;;  %34 = sbr.rel (!%p32_p4) target bundleno = 19 (0x13), region = 153 }
0x14f8   :  { %2559 = vsyncpa [#allocation3], 1 }
0x14f9   :  { %2561 = vsyncpa [#allocation3 + $0x1], 1 }
0x14fa   :  { %2562 = vsyncpa [#allocation6], 1 }
0x14fb   :  { %2563 = vsyncpa [#allocation9], 1 }
0x14fc   :  { %2564 = vsyncpa [#allocation12], 1 }
0x14fd   :  { %2565 = vsyncpa [#allocation15], 1 }
0x14fe   :  { %2566 = vsyncpa [#allocation4], 1 }
0x14ff   :  { %2568 = vsyncpa [#allocation4 + $0x1], 1 }

</bundles_post_ra>
